<compile_context>
chip_gen: v7x
topology: tpu7x:2x2x1
jax: 0.10.0
libtpu: 0.0.40
codegen_flags: <defaults>
</compile_context>

<pallas_src>
import functools

import jax
import jax.numpy as jnp
from jax.experimental import pallas as pl
from jax.experimental.pallas import tpu as pltpu

LANE = 128


def _round_up(n, m=LANE):
    return ((n + m - 1) // m) * m


def _pad_axis(x, target, axis):
    pad = target - x.shape[axis]
    if pad == 0:
        return x
    widths = [(0, 0)] * x.ndim
    widths[axis] = (0, pad)
    return jnp.pad(x, widths)


# ------------------------------ fused kernel -------------------------------- #

def _make_gbottleneck_kernel(block_num):
    """Kernel factory: conv1, (blk.conv1, blk.conv2) * block_num, conv2.

    Inputs : x (f32), A (f32), then (wstack bf16, bias f32) per GCN layer.
    Outputs: x_out, x_cat (lane-padded, f32).
    """
    n_layers = 2 + 2 * block_num

    def kernel(*refs):
        x_ref, a_ref = refs[0], refs[1]
        wrefs = refs[2:2 + 2 * n_layers]                       # (wstack, b) per layer
        x_out_ref = refs[2 + 2 * n_layers]
        x_cat_ref = refs[3 + 2 * n_layers]

        a = a_ref[...]                                         # f32 (N, N), VMEM-resident

        def gcn(h, layer_idx):
            # y = A @ (h @ W) + h @ W_loop + b
            #   = concat([A@h, h], -1) @ [W ; W_loop] + b      (K-stacked form)
            wstack = wrefs[2 * layer_idx][...]                 # bf16 (2*in_p, out_p)
            bias = wrefs[2 * layer_idx + 1][...]               # f32  (1, out_p)
            g = jnp.dot(a, h, preferred_element_type=jnp.float32)   # exact f32 A@h
            hcat = jnp.concatenate(
                [g.astype(jnp.bfloat16), h.astype(jnp.bfloat16)], axis=-1)
            y = jnp.dot(hcat, wstack, preferred_element_type=jnp.float32)
            return y + bias                                    # f32 epilogue (v5e-safe)

        h = gcn(x_ref[...], 0)                                 # conv1
        li = 1
        for _ in range(block_num):                             # GResBlocks
            t = gcn(h, li)
            t = gcn(t, li + 1)
            h = (h + t) * 0.5
            li += 2
        x_cat_ref[...] = h
        x_out_ref[...] = gcn(h, li)                            # conv2

    return kernel


# ---------------------- one-time parameter preparation ----------------------- #

def prepare_gbottleneck_params(params):
    """Hoisted out of the per-call path: pad to lane multiples, K-stack [W ; W_loop],
    cast weights to bf16 (bias stays f32). Returns (flat layer args, static meta)."""
    in_dim = params["conv1"][0].shape[0]
    hidden_dim = params["conv1"][0].shape[1]
    out_dim = params["conv2"][0].shape[1]
    block_num = len(params["blocks"])

    p_in, p_hid, p_out = _round_up(in_dim), _round_up(hidden_dim), _round_up(out_dim)

    def prep_layer(p, in_p, out_p):
        w, wl, b = p
        w_p = _pad_axis(_pad_axis(w, in_p, 0), out_p, 1)
        wl_p = _pad_axis(_pad_axis(wl, in_p, 0), out_p, 1)
        wstack = jnp.concatenate([w_p, wl_p], axis=0).astype(jnp.bfloat16)  # (2*in_p, out_p)
        b_p = _pad_axis(b, out_p, 1).astype(jnp.float32)
        return [wstack, b_p]

    layer_args = []
    layer_args += prep_layer(params["conv1"], p_in, p_hid)
    for blk in params["blocks"]:
        layer_args += prep_layer(blk["conv1"], p_hid, p_hid)
        layer_args += prep_layer(blk["conv2"], p_hid, p_hid)
    layer_args += prep_layer(params["conv2"], p_hid, p_out)

    meta = dict(block_num=block_num, in_dim=in_dim,
                hidden_dim=hidden_dim, out_dim=out_dim)
    return layer_args, meta


# ------------------------------- forward ------------------------------------- #

@functools.partial(
    jax.jit, static_argnames=("block_num", "in_dim", "hidden_dim", "out_dim"))
def gbottleneck_forward(x, adj, layer_args, *, block_num, in_dim, hidden_dim, out_dim):
    """Matches GBottleneck.forward: returns (x_out, x_cat)."""
    n = x.shape[0]
    p_in = _round_up(in_dim)
    p_hid = _round_up(hidden_dim)
    p_out = _round_up(out_dim)

    x_p = _pad_axis(x.astype(jnp.float32), p_in, 1)
    a = adj.astype(jnp.float32)

    args = [x_p, a] + list(layer_args)
    vmem_spec = pl.BlockSpec(memory_space=pltpu.MemorySpace.VMEM)

    x_out_p, x_cat_p = pl.pallas_call(
        _make_gbottleneck_kernel(block_num),
        out_shape=(jax.ShapeDtypeStruct((n, p_out), jnp.float32),
                   jax.ShapeDtypeStruct((n, p_hid), jnp.float32)),
        in_specs=[vmem_spec] * len(args),
        out_specs=(vmem_spec, vmem_spec),
        compiler_params=pltpu.CompilerParams(vmem_limit_bytes=32 * 1024 * 1024),
    )(*args)

    # Drop the zero lane-padding outside the kernel (zero padding is numerically exact).
    return x_out_p[:, :out_dim], x_cat_p[:, :hidden_dim]


# --------------------------- pure-JAX references ------------------------------ #

def reference_forward_f32(x, adj, params):
    """Torch-faithful f32 reference: original A @ (x @ W) ordering, no bf16."""
    hi = jax.lax.Precision.HIGHEST

    def gcn(h, p):
        w, wl, b = p
        return (jnp.dot(adj, jnp.dot(h, w, precision=hi), precision=hi)
                + jnp.dot(h, wl, precision=hi) + b)

    h = gcn(x, params["conv1"])
    for blk in params["blocks"]:
        t = gcn(h, blk["conv1"])
        t = gcn(t, blk["conv2"])
        h = (h + t) * 0.5
    return gcn(h, params["conv2"]), h


def reference_forward_matched(x, adj, params):
    """Reference mirroring the kernel's dtype / association choices
    (f32 A@h, bf16 weight-side matmul, K-stacked form)."""
    hi = jax.lax.Precision.HIGHEST

    def gcn(h, p):
        w, wl, b = p
        g = jnp.dot(adj, h, precision=hi)
        wstack = jnp.concatenate([w, wl], axis=0).astype(jnp.bfloat16)
        hcat = jnp.concatenate([g, h], axis=-1).astype(jnp.bfloat16)
        return jnp.dot(hcat, wstack, preferred_element_type=jnp.float32) + b

    h = gcn(x, params["conv1"])
    for blk in params["blocks"]:
        t = gcn(h, blk["conv1"])
        t = gcn(t, blk["conv2"])
        h = (h + t) * 0.5
    return gcn(h, params["conv2"]), h


# --------------------------- parameter setup -------------------------------- #

def init_gcn_params(key, in_f, out_f):
    k1, k2, k3 = jax.random.split(key, 3)
    scale = 1.0 / jnp.sqrt(jnp.float32(in_f))
    w = jax.random.uniform(k1, (in_f, out_f), jnp.float32, -scale, scale)
    wl = jax.random.uniform(k2, (in_f, out_f), jnp.float32, -scale, scale)
    b = jax.random.uniform(k3, (1, out_f), jnp.float32, -scale, scale)
    return (w, wl, b)


def init_gbottleneck_params(key, block_num, in_dim, hidden_dim, out_dim):
    keys = jax.random.split(key, 2 + 2 * block_num)
    params = {
        "conv1": init_gcn_params(keys[0], in_dim, hidden_dim),
        "conv2": init_gcn_params(keys[1], hidden_dim, out_dim),
        "blocks": [],
    }
    for i in range(block_num):
        params["blocks"].append({
            "conv1": init_gcn_params(keys[2 + 2 * i], hidden_dim, hidden_dim),
            "conv2": init_gcn_params(keys[3 + 2 * i], hidden_dim, hidden_dim),
        })
    return params


def build_adjacency(n):
    """Deterministic ring graph, row-normalized (self-loop handled by W_loop)."""
    idx = jnp.arange(n)
    a = jnp.zeros((n, n), jnp.float32)
    a = a.at[idx, (idx + 1) % n].set(1.0)
    a = a.at[idx, (idx - 1) % n].set(1.0)
    a = a / a.sum(axis=1, keepdims=True)
    return a


# ------------------------------- main ---------------------------------------- #

if __name__ == "__main__":
    N_VERTS = 64      # number of graph vertices
    IN_DIM = 32
    HIDDEN_DIM = 32
    OUT_DIM = 16
    BLOCK_NUM = 2

    root = jax.random.PRNGKey(0)
    k_x, k_p = jax.random.split(root)

    x = jax.random.normal(k_x, (N_VERTS, IN_DIM), jnp.float32)
    adj = build_adjacency(N_VERTS)
    params = init_gbottleneck_params(k_p, BLOCK_NUM, IN_DIM, HIDDEN_DIM, OUT_DIM)

    # One-time weight prep (hoisted out of the per-forward call path).
    layer_args, meta = prepare_gbottleneck_params(params)
    layer_args = jax.block_until_ready(layer_args)

    x_out, x_cat = gbottleneck_forward(x, adj, layer_args, **meta)
    jax.block_until_ready((x_out, x_cat))

    assert x_out.shape == (N_VERTS, OUT_DIM), x_out.shape
    assert x_cat.shape == (N_VERTS, HIDDEN_DIM), x_cat.shape
    assert jnp.all(jnp.isfinite(x_out)) and jnp.all(jnp.isfinite(x_cat))

    # (1) Numerical parity vs. a reference using the kernel's own dtype choices.
    m_out, m_cat = reference_forward_matched(x, adj, params)
    assert float(jnp.max(jnp.abs(x_out - m_out))) < 3e-2
    assert float(jnp.max(jnp.abs(x_cat - m_cat))) < 3e-2

    # (2) Parity vs. the torch-faithful pure-f32 reference (bf16 weight matmul only
    #     source of divergence).
    f_out, f_cat = reference_forward_f32(x, adj, params)
    assert float(jnp.max(jnp.abs(x_out - f_out))) < 1e-1
    assert float(jnp.max(jnp.abs(x_cat - f_cat))) < 1e-1

    print("KERNEL_OK")
</pallas_src>

<mosaic_0001>
module attributes {stable_mosaic.version = 11 : i64} {
  func.func @kernel(%arg0: memref<64x128xf32, #tpu.memory_space<vmem>>, %arg1: memref<64x64xf32, #tpu.memory_space<vmem>>, %arg2: memref<256x128xbf16, #tpu.memory_space<vmem>>, %arg3: memref<1x128xf32, #tpu.memory_space<vmem>>, %arg4: memref<256x128xbf16, #tpu.memory_space<vmem>>, %arg5: memref<1x128xf32, #tpu.memory_space<vmem>>, %arg6: memref<256x128xbf16, #tpu.memory_space<vmem>>, %arg7: memref<1x128xf32, #tpu.memory_space<vmem>>, %arg8: memref<256x128xbf16, #tpu.memory_space<vmem>>, %arg9: memref<1x128xf32, #tpu.memory_space<vmem>>, %arg10: memref<256x128xbf16, #tpu.memory_space<vmem>>, %arg11: memref<1x128xf32, #tpu.memory_space<vmem>>, %arg12: memref<256x128xbf16, #tpu.memory_space<vmem>>, %arg13: memref<1x128xf32, #tpu.memory_space<vmem>>, %arg14: memref<64x128xf32, #tpu.memory_space<vmem>>, %arg15: memref<64x128xf32, #tpu.memory_space<vmem>>) attributes {dimension_semantics = [], scalar_prefetch = 0 : i64, scratch_operands = 0 : i64, tpu.core_type = #tpu.core_type<tc>} {
    %c0 = arith.constant 0 : index
    %c0_0 = arith.constant 0 : index
    %0 = vector.load %arg1[%c0, %c0_0] : memref<64x64xf32, #tpu.memory_space<vmem>>, vector<64x64xf32>
    %c0_1 = arith.constant 0 : index
    %c0_2 = arith.constant 0 : index
    %1 = vector.load %arg0[%c0_1, %c0_2] : memref<64x128xf32, #tpu.memory_space<vmem>>, vector<64x128xf32>
    %c0_3 = arith.constant 0 : index
    %c0_4 = arith.constant 0 : index
    %2 = vector.load %arg2[%c0_3, %c0_4] : memref<256x128xbf16, #tpu.memory_space<vmem>>, vector<256x128xbf16>
    %c0_5 = arith.constant 0 : index
    %c0_6 = arith.constant 0 : index
    %3 = vector.load %arg3[%c0_5, %c0_6] : memref<1x128xf32, #tpu.memory_space<vmem>>, vector<1x128xf32>
    %cst = arith.constant dense<0.000000e+00> : vector<64x128xf32>
    %4 = tpu.matmul %0, %1, %cst {dimension_numbers = #tpu.dot_dimension_numbers<[1], [0], [0], [1], [0, 0, 1, 1], [], []>} : vector<64x64xf32>, vector<64x128xf32>, vector<64x128xf32> -> vector<64x128xf32>
    %5 = arith.truncf %4 : vector<64x128xf32> to vector<64x128xbf16>
    %6 = arith.truncf %1 : vector<64x128xf32> to vector<64x128xbf16>
    %7 = tpu.concatenate %5, %6 in 1 : vector<64x128xbf16>, vector<64x128xbf16> -> vector<64x256xbf16>
    %cst_7 = arith.constant dense<0.000000e+00> : vector<64x128xf32>
    %8 = tpu.matmul %7, %2, %cst_7 {dimension_numbers = #tpu.dot_dimension_numbers<[1], [0], [0], [1], [0, 0, 1, 1], [], []>} : vector<64x256xbf16>, vector<256x128xbf16>, vector<64x128xf32> -> vector<64x128xf32>
    %9 = vector.broadcast %3 : vector<1x128xf32> to vector<64x128xf32>
    %10 = arith.addf %8, %9 : vector<64x128xf32>
    %c0_8 = arith.constant 0 : index
    %c0_9 = arith.constant 0 : index
    %11 = vector.load %arg4[%c0_8, %c0_9] : memref<256x128xbf16, #tpu.memory_space<vmem>>, vector<256x128xbf16>
    %c0_10 = arith.constant 0 : index
    %c0_11 = arith.constant 0 : index
    %12 = vector.load %arg5[%c0_10, %c0_11] : memref<1x128xf32, #tpu.memory_space<vmem>>, vector<1x128xf32>
    %cst_12 = arith.constant dense<0.000000e+00> : vector<64x128xf32>
    %13 = tpu.matmul %0, %10, %cst_12 {dimension_numbers = #tpu.dot_dimension_numbers<[1], [0], [0], [1], [0, 0, 1, 1], [], []>} : vector<64x64xf32>, vector<64x128xf32>, vector<64x128xf32> -> vector<64x128xf32>
    %14 = arith.truncf %13 : vector<64x128xf32> to vector<64x128xbf16>
    %15 = arith.truncf %10 : vector<64x128xf32> to vector<64x128xbf16>
    %16 = tpu.concatenate %14, %15 in 1 : vector<64x128xbf16>, vector<64x128xbf16> -> vector<64x256xbf16>
    %cst_13 = arith.constant dense<0.000000e+00> : vector<64x128xf32>
    %17 = tpu.matmul %16, %11, %cst_13 {dimension_numbers = #tpu.dot_dimension_numbers<[1], [0], [0], [1], [0, 0, 1, 1], [], []>} : vector<64x256xbf16>, vector<256x128xbf16>, vector<64x128xf32> -> vector<64x128xf32>
    %18 = vector.broadcast %12 : vector<1x128xf32> to vector<64x128xf32>
    %19 = arith.addf %17, %18 : vector<64x128xf32>
    %c0_14 = arith.constant 0 : index
    %c0_15 = arith.constant 0 : index
    %20 = vector.load %arg6[%c0_14, %c0_15] : memref<256x128xbf16, #tpu.memory_space<vmem>>, vector<256x128xbf16>
    %c0_16 = arith.constant 0 : index
    %c0_17 = arith.constant 0 : index
    %21 = vector.load %arg7[%c0_16, %c0_17] : memref<1x128xf32, #tpu.memory_space<vmem>>, vector<1x128xf32>
    %cst_18 = arith.constant dense<0.000000e+00> : vector<64x128xf32>
    %22 = tpu.matmul %0, %19, %cst_18 {dimension_numbers = #tpu.dot_dimension_numbers<[1], [0], [0], [1], [0, 0, 1, 1], [], []>} : vector<64x64xf32>, vector<64x128xf32>, vector<64x128xf32> -> vector<64x128xf32>
    %23 = arith.truncf %22 : vector<64x128xf32> to vector<64x128xbf16>
    %24 = arith.truncf %19 : vector<64x128xf32> to vector<64x128xbf16>
    %25 = tpu.concatenate %23, %24 in 1 : vector<64x128xbf16>, vector<64x128xbf16> -> vector<64x256xbf16>
    %cst_19 = arith.constant dense<0.000000e+00> : vector<64x128xf32>
    %26 = tpu.matmul %25, %20, %cst_19 {dimension_numbers = #tpu.dot_dimension_numbers<[1], [0], [0], [1], [0, 0, 1, 1], [], []>} : vector<64x256xbf16>, vector<256x128xbf16>, vector<64x128xf32> -> vector<64x128xf32>
    %27 = vector.broadcast %21 : vector<1x128xf32> to vector<64x128xf32>
    %28 = arith.addf %26, %27 : vector<64x128xf32>
    %29 = arith.addf %10, %28 : vector<64x128xf32>
    %cst_20 = arith.constant 5.000000e-01 : f32
    %30 = vector.broadcast %cst_20 : f32 to vector<64x128xf32>
    %31 = arith.mulf %29, %30 : vector<64x128xf32>
    %c0_21 = arith.constant 0 : index
    %c0_22 = arith.constant 0 : index
    %32 = vector.load %arg8[%c0_21, %c0_22] : memref<256x128xbf16, #tpu.memory_space<vmem>>, vector<256x128xbf16>
    %c0_23 = arith.constant 0 : index
    %c0_24 = arith.constant 0 : index
    %33 = vector.load %arg9[%c0_23, %c0_24] : memref<1x128xf32, #tpu.memory_space<vmem>>, vector<1x128xf32>
    %cst_25 = arith.constant dense<0.000000e+00> : vector<64x128xf32>
    %34 = tpu.matmul %0, %31, %cst_25 {dimension_numbers = #tpu.dot_dimension_numbers<[1], [0], [0], [1], [0, 0, 1, 1], [], []>} : vector<64x64xf32>, vector<64x128xf32>, vector<64x128xf32> -> vector<64x128xf32>
    %35 = arith.truncf %34 : vector<64x128xf32> to vector<64x128xbf16>
    %36 = arith.truncf %31 : vector<64x128xf32> to vector<64x128xbf16>
    %37 = tpu.concatenate %35, %36 in 1 : vector<64x128xbf16>, vector<64x128xbf16> -> vector<64x256xbf16>
    %cst_26 = arith.constant dense<0.000000e+00> : vector<64x128xf32>
    %38 = tpu.matmul %37, %32, %cst_26 {dimension_numbers = #tpu.dot_dimension_numbers<[1], [0], [0], [1], [0, 0, 1, 1], [], []>} : vector<64x256xbf16>, vector<256x128xbf16>, vector<64x128xf32> -> vector<64x128xf32>
    %39 = vector.broadcast %33 : vector<1x128xf32> to vector<64x128xf32>
    %40 = arith.addf %38, %39 : vector<64x128xf32>
    %c0_27 = arith.constant 0 : index
    %c0_28 = arith.constant 0 : index
    %41 = vector.load %arg10[%c0_27, %c0_28] : memref<256x128xbf16, #tpu.memory_space<vmem>>, vector<256x128xbf16>
    %c0_29 = arith.constant 0 : index
    %c0_30 = arith.constant 0 : index
    %42 = vector.load %arg11[%c0_29, %c0_30] : memref<1x128xf32, #tpu.memory_space<vmem>>, vector<1x128xf32>
    %cst_31 = arith.constant dense<0.000000e+00> : vector<64x128xf32>
    %43 = tpu.matmul %0, %40, %cst_31 {dimension_numbers = #tpu.dot_dimension_numbers<[1], [0], [0], [1], [0, 0, 1, 1], [], []>} : vector<64x64xf32>, vector<64x128xf32>, vector<64x128xf32> -> vector<64x128xf32>
    %44 = arith.truncf %43 : vector<64x128xf32> to vector<64x128xbf16>
    %45 = arith.truncf %40 : vector<64x128xf32> to vector<64x128xbf16>
    %46 = tpu.concatenate %44, %45 in 1 : vector<64x128xbf16>, vector<64x128xbf16> -> vector<64x256xbf16>
    %cst_32 = arith.constant dense<0.000000e+00> : vector<64x128xf32>
    %47 = tpu.matmul %46, %41, %cst_32 {dimension_numbers = #tpu.dot_dimension_numbers<[1], [0], [0], [1], [0, 0, 1, 1], [], []>} : vector<64x256xbf16>, vector<256x128xbf16>, vector<64x128xf32> -> vector<64x128xf32>
    %48 = vector.broadcast %42 : vector<1x128xf32> to vector<64x128xf32>
    %49 = arith.addf %47, %48 : vector<64x128xf32>
    %50 = arith.addf %31, %49 : vector<64x128xf32>
    %cst_33 = arith.constant 5.000000e-01 : f32
    %51 = vector.broadcast %cst_33 : f32 to vector<64x128xf32>
    %52 = arith.mulf %50, %51 : vector<64x128xf32>
    %c0_34 = arith.constant 0 : index
    %c0_35 = arith.constant 0 : index
    %53 = vector.load %arg15[%c0_34, %c0_35] : memref<64x128xf32, #tpu.memory_space<vmem>>, vector<64x128xf32>
    tpu.vector_store %arg15[%c0_34, %c0_35], %52 {strides = array<i32>} : memref<64x128xf32, #tpu.memory_space<vmem>>, vector<64x128xf32>,
    %c0_36 = arith.constant 0 : index
    %c0_37 = arith.constant 0 : index
    %54 = vector.load %arg12[%c0_36, %c0_37] : memref<256x128xbf16, #tpu.memory_space<vmem>>, vector<256x128xbf16>
    %c0_38 = arith.constant 0 : index
    %c0_39 = arith.constant 0 : index
    %55 = vector.load %arg13[%c0_38, %c0_39] : memref<1x128xf32, #tpu.memory_space<vmem>>, vector<1x128xf32>
    %cst_40 = arith.constant dense<0.000000e+00> : vector<64x128xf32>
    %56 = tpu.matmul %0, %52, %cst_40 {dimension_numbers = #tpu.dot_dimension_numbers<[1], [0], [0], [1], [0, 0, 1, 1], [], []>} : vector<64x64xf32>, vector<64x128xf32>, vector<64x128xf32> -> vector<64x128xf32>
    %57 = arith.truncf %56 : vector<64x128xf32> to vector<64x128xbf16>
    %58 = arith.truncf %52 : vector<64x128xf32> to vector<64x128xbf16>
    %59 = tpu.concatenate %57, %58 in 1 : vector<64x128xbf16>, vector<64x128xbf16> -> vector<64x256xbf16>
    %cst_41 = arith.constant dense<0.000000e+00> : vector<64x128xf32>
    %60 = tpu.matmul %59, %54, %cst_41 {dimension_numbers = #tpu.dot_dimension_numbers<[1], [0], [0], [1], [0, 0, 1, 1], [], []>} : vector<64x256xbf16>, vector<256x128xbf16>, vector<64x128xf32> -> vector<64x128xf32>
    %61 = vector.broadcast %55 : vector<1x128xf32> to vector<64x128xf32>
    %62 = arith.addf %60, %61 : vector<64x128xf32>
    %c0_42 = arith.constant 0 : index
    %c0_43 = arith.constant 0 : index
    %63 = vector.load %arg14[%c0_42, %c0_43] : memref<64x128xf32, #tpu.memory_space<vmem>>, vector<64x128xf32>
    tpu.vector_store %arg14[%c0_42, %c0_43], %62 {strides = array<i32>} : memref<64x128xf32, #tpu.memory_space<vmem>>, vector<64x128xf32>,
    return
  }
}

</mosaic_0001>

<bundles_post_ra>
// kernel: gbottleneck_forward.1
= control target key start
LH: loop header
LB: loop body
LE: loop exit
PB: predicated region body
PF: predicated region fallthrough
CT: control target
= control target key end

     0   :  { %s3714_s0 = inlined_call_operand.vmem [shape: f32[64,128], index: 0, kind: input, shape index: {}]   ;;  %s3715_s1 = inlined_call_operand.hbm [shape: f32[64,64], index: 1, kind: input, shape index: {}]   ;;  %s3716_s2 = inlined_call_operand.vmem [shape: bf16[256,128], index: 2, kind: input, shape index: {}]   ;;  %s3717_s3 = inlined_call_operand.vmem [shape: f32[1,128], index: 3, kind: input, shape index: {}]   ;;  %s3718_s4 = inlined_call_operand.hbm [shape: bf16[256,128], index: 4, kind: input, shape index: {}]   ;;  %s3719_s5 = inlined_call_operand.vmem [shape: f32[1,128], index: 5, kind: input, shape index: {}]   ;;  %s3720_s6 = inlined_call_operand.hbm [shape: bf16[256,128], index: 6, kind: input, shape index: {}]   ;;  %s3721_s7 = inlined_call_operand.vmem [shape: f32[1,128], index: 7, kind: input, shape index: {}]   ;;  %s3722_s8 = inlined_call_operand.hbm [shape: bf16[256,128], index: 8, kind: input, shape index: {}]   ;;  %s3723_s9 = inlined_call_operand.hbm [shape: f32[1,128], index: 9, kind: input, shape index: {}]   ;;  %s3724_s10 = inlined_call_operand.vmem [shape: bf16[256,128], index: 10, kind: input, shape index: {}]   ;;  %s3725_s11 = inlined_call_operand.vmem [shape: f32[1,128], index: 11, kind: input, shape index: {}]   ;;  %s3726_s12 = inlined_call_operand.hbm [shape: bf16[256,128], index: 12, kind: input, shape index: {}]   ;;  %s3727_s13 = inlined_call_operand.vmem [shape: f32[1,128], index: 13, kind: input, shape index: {}]   ;;  %s3728_s14 = inlined_call_operand.vmem [shape: f32[64,128], index: 14, kind: output, shape index: {0}]   ;;  %s3729_s15 = inlined_call_operand.vmem [shape: f32[64,128], index: 15, kind: output, shape index: {1}]  }
   0x1   :  { %3731 = sst [smem:[#allocation16_spill]] %s3728_s14 }
   0x2   :  { %21 = vsyncpa [#allocation3], 0 }
   0x3   :  { %22 = vsyncpa [#allocation5], 0 }
   0x4   :  { %23 = vsyncpa [#allocation8], 0 }
   0x5   :  { %24 = vsyncpa [#allocation11], 0  ;;  %s3113_s18 = smov [#allocation4]   ;;  %s2973_s22 = scalar_lea.hbm %s3718_s4, 2048 }
   0x6   :  { %s48_s19 = sshll.u32 %s3113_s18, 4  ;;  %p2974_p0 = scmp.ne.s32.totalorder %s3718_s4, %s2973_s22  ;;  %s49_s19 = int_to_ptr.vmem [resolvable:$true] %s48_s19 }
   0x7   :  { %p2977_p1 = scmp.lt.u32.totalorder %s2973_s22, %s3718_s4 }
   0x9   :  { %p2979_p2 = pnand %p2977_p1, %p2974_p0 }
   0xb   :  { %2982 = shalt.err (!%p2979_p2)
}
   0xc   :  { %s2983_s27 = scalar_lea.vmem %s49_s19, 2048  ;;  %p2988_p4 = scmp.lt.s32.totalorder %s49_s19, %s49_s19 }
   0xd   :  { %p2984_p3 = scmp.ne.s32.totalorder %s49_s19, %s2983_s27  ;;  %p2989_p5 = scmp.lt.s32.totalorder %s2983_s27, %s2983_s27 }
   0xf   :  { %p2990_p6 = por %p2989_p5, %p2988_p4 }
  0x11   :  { %p2991_p7 = pnand %p2990_p6, %p2984_p3 }
  0x13   :  { %2994 = shalt.err (!%p2991_p7)
}
  0x14   :  { %s3114_s28 = smov 64   ;;  %s3115_s29 = smov 4  }
  0x15   :  { %54 = dma.hbm_to_vmem [thread:$0]  %s3718_s4, 2048, %s49_s19, [#allocation5], %s3114_s28, %s3114_s28, %s3115_s29  }
  0x16   :  { %s3116_s17 = smov [#allocation7]   ;;  %s3117_s20 = smov [#allocation2]  }
  0x17   :  { %s76_s18 = sshll.u32 %s3116_s17, 4  ;;  %s32_s21 = sshll.u32 %s3117_s20, 4  ;;  %s77_s18 = int_to_ptr.vmem [resolvable:$true] %s76_s18  ;;  %s33_s21 = int_to_ptr.vmem [resolvable:$true] %s32_s21 }
  0x18   :  { %s2995_s24 = scalar_lea.hbm %s3722_s8, 2048 }
  0x19   :  { %p2996_p8 = scmp.ne.s32.totalorder %s3722_s8, %s2995_s24  ;;  %p2999_p9 = scmp.lt.u32.totalorder %s2995_s24, %s3722_s8 }
  0x1b   :  { %p3001_p10 = pnand %p2999_p9, %p2996_p8 }
  0x1d   :  { %3004 = shalt.err (!%p3001_p10)
}
  0x1e   :  { %s3005_s4 = scalar_lea.vmem %s77_s18, 2048  ;;  %p3010_p12 = scmp.lt.s32.totalorder %s77_s18, %s77_s18 }
  0x1f   :  { %p3006_p11 = scmp.ne.s32.totalorder %s77_s18, %s3005_s4  ;;  %p3011_p13 = scmp.lt.s32.totalorder %s3005_s4, %s3005_s4 }
  0x21   :  { %p3012_p0 = por %p3011_p13, %p3010_p12 }
  0x23   :  { %p3013_p1 = pnand %p3012_p0, %p3006_p11 }
  0x25   :  { %3016 = shalt.err (!%p3013_p1)
}
  0x26   :  { %82 = dma.hbm_to_vmem [thread:$0]  %s3722_s8, 2048, %s77_s18, [#allocation8], %s3114_s28, %s3114_s28, %s3115_s29  }
  0x27   :  { %s3017_s17 = scalar_lea.hbm %s3715_s1, 1024 }
  0x28   :  { %p3018_p2 = scmp.ne.s32.totalorder %s3715_s1, %s3017_s17  ;;  %p3021_p3 = scmp.lt.u32.totalorder %s3017_s17, %s3715_s1 }
  0x2a   :  { %p3023_p4 = pnand %p3021_p3, %p3018_p2 }
  0x2c   :  { %3026 = shalt.err (!%p3023_p4)
}
  0x2d   :  { %s3027_s25 = scalar_lea.vmem %s33_s21, 1024  ;;  %p3032_p6 = scmp.lt.s32.totalorder %s33_s21, %s33_s21 }
  0x2e   :  { %p3028_p5 = scmp.ne.s32.totalorder %s33_s21, %s3027_s25  ;;  %p3033_p7 = scmp.lt.s32.totalorder %s3027_s25, %s3027_s25 }
  0x30   :  { %p3034_p8 = por %p3033_p7, %p3032_p6 }
  0x32   :  { %p3035_p9 = pnand %p3034_p8, %p3028_p5 }
  0x34   :  { %3038 = shalt.err (!%p3035_p9)
}
  0x35   :  { %s3118_s8 = smov 128   ;;  %s3119_s18 = smov 8  }
  0x36   :  { %38 = dma.hbm_to_vmem [thread:$0]  %s3715_s1, 1024, %s33_s21, [#allocation3], %s3118_s8, %s3118_s8, %s3119_s18  }
  0x37   :  { %s3120_s4 = smov [#allocation6]   ;;  %s3121_s30 = smov [#allocation9]  }
  0x38   :  { %s62_s19 = sshll.u32 %s3120_s4, 4  ;;  %s89_s16 = sshll.u32 %s3121_s30, 4  ;;  %s63_s19 = int_to_ptr.vmem [resolvable:$true] %s62_s19  ;;  %s90_s16 = int_to_ptr.vmem [resolvable:$true] %s89_s16 }
  0x39   :  { %s3039_s20 = scalar_lea.hbm %s3720_s6, 2048 }
  0x3a   :  { %p3040_p10 = scmp.ne.s32.totalorder %s3720_s6, %s3039_s20  ;;  %p3043_p11 = scmp.lt.u32.totalorder %s3039_s20, %s3720_s6 }
  0x3c   :  { %p3045_p12 = pnand %p3043_p11, %p3040_p10 }
  0x3e   :  { %3048 = shalt.err (!%p3045_p12)
}
  0x3f   :  { %s3049_s1 = scalar_lea.vmem %s63_s19, 2048  ;;  %p3054_p0 = scmp.lt.s32.totalorder %s63_s19, %s63_s19 }
  0x40   :  { %p3050_p13 = scmp.ne.s32.totalorder %s63_s19, %s3049_s1  ;;  %p3055_p1 = scmp.lt.s32.totalorder %s3049_s1, %s3049_s1 }
  0x42   :  { %p3056_p2 = por %p3055_p1, %p3054_p0 }
  0x44   :  { %p3057_p3 = pnand %p3056_p2, %p3050_p13 }
  0x46   :  { %3060 = shalt.err (!%p3057_p3)
}
  0x47   :  { %68 = dma.hbm_to_vmem [thread:$0]  %s3720_s6, 2048, %s63_s19, [#allocation5], %s3114_s28, %s3114_s28, %s3115_s29  }
  0x48   :  { %s3061_s27 = scalar_lea.hbm %s3723_s9, 16 }
  0x49   :  { %p3062_p4 = scmp.ne.s32.totalorder %s3723_s9, %s3061_s27  ;;  %p3065_p5 = scmp.lt.u32.totalorder %s3061_s27, %s3723_s9 }
  0x4b   :  { %p3067_p6 = pnand %p3065_p5, %p3062_p4 }
  0x4d   :  { %3070 = shalt.err (!%p3067_p6)
}
  0x4e   :  { %s3071_s20 = scalar_lea.vmem %s90_s16, 16  ;;  %s3075_s22 = scalar_lea.vmem %s90_s16, 32 }
  0x4f   :  { %p3072_p7 = scmp.ne.s32.totalorder %s90_s16, %s3071_s20  ;;  %p3076_p8 = scmp.lt.s32.totalorder %s90_s16, %s90_s16 }
  0x50   :  { %p3077_p9 = scmp.lt.s32.totalorder %s3075_s22, %s3071_s20 }
  0x52   :  { %p3078_p10 = por %p3077_p9, %p3076_p8 }
  0x54   :  { %p3079_p11 = pnand %p3078_p10, %p3072_p7 }
  0x56   :  { %3082 = shalt.err (!%p3079_p11)
}
  0x57   :  { %92 = dma.hbm_to_vmem [thread:$0]  %s3723_s9, 16, %s90_s16, [#allocation8]  }
  0x58   :  { %s3122_s23 = smov [#allocation10]   ;;  %s3083_s21 = scalar_lea.hbm %s3726_s12, 2048 }
  0x59   :  { %s102_s24 = sshll.u32 %s3122_s23, 4  ;;  %p3084_p12 = scmp.ne.s32.totalorder %s3726_s12, %s3083_s21  ;;  %s103_s24 = int_to_ptr.vmem [resolvable:$true] %s102_s24 }
  0x5a   :  { %p3087_p13 = scmp.lt.u32.totalorder %s3083_s21, %s3726_s12 }
  0x5c   :  { %p3089_p0 = pnand %p3087_p13, %p3084_p12 }
  0x5e   :  { %3092 = shalt.err (!%p3089_p0)
}
  0x5f   :  { %s3093_s4 = scalar_lea.vmem %s103_s24, 2048  ;;  %p3098_p2 = scmp.lt.s32.totalorder %s103_s24, %s103_s24 }
  0x60   :  { %p3094_p1 = scmp.ne.s32.totalorder %s103_s24, %s3093_s4  ;;  %p3099_p3 = scmp.lt.s32.totalorder %s3093_s4, %s3093_s4 }
  0x62   :  { %p3100_p4 = por %p3099_p3, %p3098_p2 }
  0x64   :  { %p3101_p5 = pnand %p3100_p4, %p3094_p1 }
  0x66   :  { %3104 = shalt.err (!%p3101_p5)
}
  0x67   :  { %108 = dma.hbm_to_vmem [thread:$0]  %s3726_s12, 2048, %s103_s24, [#allocation11], %s3114_s28, %s3114_s28, %s3115_s29  }
  0x68   :  { %3105 = dma.done.wait [#allocation3], 1024  }
  0x69   :  { %3106 = vsyncadd [#allocation3], 4294966272 }
  0x6a   :  { %3107 = dma.done.wait [#allocation5], 4096  }
  0x6b   :  { %3108 = vsyncadd [#allocation5], 4294963200 }
  0x6c   :  { %3109 = dma.done.wait [#allocation8], 2064  }
  0x6d   :  { %3110 = vsyncadd [#allocation8], 4294965232 }
  0x6e   :  { %3111 = dma.done.wait [#allocation11], 2048  }
  0x6f   :  { %3112 = vsyncadd [#allocation11], 4294965248  ;;  %v138_v0 = vld [vmem:[%s3714_s0] sm:$0xff]  ;;  %v139_v1 = vld [vmem:[%s3714_s0 + $0x8] sm:$0xff]  ;;  %vm179_vm0 = vcmask 523264   ;;  %s3732_s20 = sld [smem:[#allocation16_spill]] }
  0x70   :  { %v140_v2 = vld [vmem:[%s3714_s0 + $0x10] sm:$0xff]  ;;  %v2763_v3 = vpack.c.bf16 %v139_v1, %v138_v0  ;;  %v141_v4 = vld [vmem:[%s3714_s0 + $0x18] sm:$0xff]  ;;  %v142_v6 = vld [vmem:[%s3714_s0 + $0x20] sm:$0xff] }
  0x71   :  { %v3299_v5 = vpack.c.bf16 %v141_v4, %v140_v2  ;;  %v143_v7 = vld [vmem:[%s3714_s0 + $0x28] sm:$0xff]  ;;  %v3307_v8 = vld [vmem:[#allocation2] sm:$0xff]  ;;  %v144_v10 = vld [vmem:[%s3714_s0 + $0x30] sm:$0xff] }
  0x72   :  { %2764 = vmatprep.subr.bf16.mxu1 %v2763_v3  ;;  %2611 = vmatprep.mubr.msk.f32.mxu1 %vm179_vm0, %v3307_v8  ;;  %v3314_v9 = vpack.c.bf16 %v143_v7, %v142_v6  ;;  %v145_v11 = vld [vmem:[%s3714_s0 + $0x38] sm:$0xff]  ;;  %v2869_v13 = vld [vmem:[%s3716_s2 + $0x40] sm:$0xff]   ;;  %v3331_v14 = vld [vmem:[#allocation2 + $0x8] sm:$0xff] }
  0x73   :  { %2766 = vmatpush3.bf16.msra.mxu1 %v2763_v3  ;;  %2639 = vmatprep.mubr.msk.f32.mxu0 %vm179_vm0, %v3307_v8  ;;  %v3324_v12 = vpack.c.bf16 %v145_v11, %v144_v10  ;;  %v3333_v15 = vld [vmem:[#allocation2 + $0x10] sm:$0xff]  ;;  %v2870_v16 = vld [vmem:[%s3716_s2] sm:$0xff]   ;;  %v2871_v17 = vld [vmem:[%s3716_s2 + $0x48] sm:$0xff]  }
  0x74   :  { %2768 = vmatprep.subr.bf16.mxu1 %v3299_v5  ;;  %v3342_v18 = vld [vmem:[#allocation2 + $0x18] sm:$0xff]  ;;  %v2872_v19 = vld [vmem:[%s3716_s2 + $0x8] sm:$0xff]   ;;  %v3349_v20 = vld [vmem:[#allocation2 + $0x20] sm:$0xff] }
  0x75   :  { %v2873_v21 = vld [vmem:[%s3716_s2 + $0x50] sm:$0xff]   ;;  %v3356_v22 = vld [vmem:[#allocation2 + $0x28] sm:$0xff]  ;;  %v2875_v25 = vld [vmem:[%s3716_s2 + $0x58] sm:$0xff]  }
  0x76   :  { %v2874_v23 = vld [vmem:[%s3716_s2 + $0x10] sm:$0xff]   ;;  %v3370_v26 = vld [vmem:[#allocation2 + $0x38] sm:$0xff]  ;;  %v2877_v28 = vld [vmem:[%s3716_s2 + $0x60] sm:$0xff]  }
  0x77   :  { %2770 = vmatpush3.bf16.msra.mxu1 %v3299_v5  ;;  %v3363_v24 = vld [vmem:[#allocation2 + $0x30] sm:$0xff]  ;;  %v2876_v27 = vld [vmem:[%s3716_s2 + $0x18] sm:$0xff]   ;;  %v2878_v29 = vld [vmem:[%s3716_s2 + $0x20] sm:$0xff]  }
  0x78   :  { %2772 = vmatprep.subr.bf16.mxu1 %v3314_v9  ;;  %v2879_v30 = vld [vmem:[%s3716_s2 + $0x68] sm:$0xff]   ;;  %v2881_v32 = vld [vmem:[%s3716_s2 + $0x70] sm:$0xff]   ;;  %v2883_v34 = vld [vmem:[%s3716_s2 + $0x78] sm:$0xff]  }
  0x79   :  { %v2880_v31 = vld [vmem:[%s3716_s2 + $0x28] sm:$0xff]   ;;  %v2882_v33 = vld [vmem:[%s3716_s2 + $0x30] sm:$0xff]   ;;  %v2884_v35 = vld [vmem:[%s3716_s2 + $0x38] sm:$0xff]  }
  0x7a   :  { %v2117_v52 = vld [vmem:[%s3717_s3] ss:$0 sm:$0xff] }
  0x7b   :  { %2774 = vmatpush3.bf16.msra.mxu1 %v3314_v9 }
  0x7c   :  { %2776 = vmatprep.subr.bf16.mxu1 %v3324_v12 }
  0x7f   :  { %2778 = vmatpush3.bf16.msra.mxu1 %v3324_v12 }
  0x80   :  { %2275 = vmatprep.subr.bf16.mxu1 %v2869_v13 }
  0x82   :  { %2612 = vmatmul.mubr.msk.f32.vlgmr.msra.gmra.mrb[0].mxu1 %vm179_vm0, %v3331_v14 }
  0x83   :  { %2614 = vmatprep.mubr.msk.f32.mxu1 %vm179_vm0, %v3333_v15  ;;  %2276 = vmatpush3.bf16.msra.mxu1 %v2870_v16 }
  0x84   :  { %2277 = vmatprep.subr.bf16.mxu1 %v2871_v17 }
  0x86   :  { %2615 = vmatmul.mubr.msk.f32.gmra.mrb[2].mxu1 %vm179_vm0, %v3342_v18 }
  0x87   :  { %2617 = vmatprep.mubr.msk.f32.mxu1 %vm179_vm0, %v3349_v20  ;;  %2278 = vmatpush3.bf16.msra.mxu1 %v2872_v19 }
  0x88   :  { %2279 = vmatprep.subr.bf16.mxu1 %v2873_v21 }
  0x8a   :  { %2618 = vmatmul.mubr.msk.f32.gmra.mrb[4].mxu1 %vm179_vm0, %v3356_v22 }
  0x8b   :  { %2620 = vmatprep.mubr.msk.f32.mxu1 %vm179_vm0, %v3363_v24  ;;  %2280 = vmatpush3.bf16.msra.mxu1 %v2874_v23 }
  0x8c   :  { %2281 = vmatprep.subr.bf16.mxu1 %v2875_v25 }
  0x8e   :  { %2621 = vmatmul.mubr.msk.f32.gmra.mrb[6].mxu1 %vm179_vm0, %v3370_v26 }
  0x8f   :  { %2282 = vmatpush3.bf16.msra.mxu1 %v2876_v27  ;;  %451 = vmatprep.mubr.bf16.mxu1 %v2763_v3 }
  0x90   :  { %2283 = vmatprep.subr.bf16.mxu1 %v2877_v28 }
  0x93   :  { %2284 = vmatpush3.bf16.msra.mxu1 %v2878_v29  ;;  %v2885_v29 = vld [vmem:[#allocation4 + $0x40] sm:$0xff]  }
  0x94   :  { %2285 = vmatprep.subr.bf16.mxu1 %v2879_v30  ;;  %v2886_v30 = vld [vmem:[#allocation4] sm:$0xff]  }
  0x97   :  { %2286 = vmatpush3.bf16.msra.mxu1 %v2880_v31  ;;  %v2887_v31 = vld [vmem:[#allocation4 + $0x48] sm:$0xff]  }
  0x98   :  { %2287 = vmatprep.subr.bf16.mxu1 %v2881_v32  ;;  %v2888_v32 = vld [vmem:[#allocation4 + $0x8] sm:$0xff]  }
  0x9b   :  { %2288 = vmatpush3.bf16.msra.mxu1 %v2882_v33  ;;  %v2889_v33 = vld [vmem:[#allocation4 + $0x50] sm:$0xff]  }
  0x9c   :  { %2289 = vmatprep.subr.bf16.mxu1 %v2883_v34  ;;  %v2890_v34 = vld [vmem:[#allocation4 + $0x10] sm:$0xff]  }
  0x9f   :  { %2290 = vmatpush3.bf16.msra.mxu1 %v2884_v35  ;;  %v2891_v35 = vld [vmem:[#allocation4 + $0x58] sm:$0xff]  }
 0x155   :  { %v2613_v36 = vpop.f32.mrb[0].mxu1 }
 0x156   :  { %v270_v37 = vpop.f32.mrb[1].mxu1 }
 0x157   :  { %v309_v38 = vpack.c.bf16 %v2613_v36, %v270_v37  ;;  %v2892_v36 = vld [vmem:[#allocation4 + $0x18] sm:$0xff]   ;;  %v2893_v37 = vld [vmem:[#allocation4 + $0x60] sm:$0xff]  }
 0x159   :  { %452 = vmatmul.mubr.bf16.vlgmr.msra.gmra.mrb[8].mxu1 %v309_v38  ;;  %v2616_v39 = vpop.f32.mrb[2].mxu1  ;;  %v2894_v38 = vld [vmem:[#allocation4 + $0x20] sm:$0xff]  }
 0x15a   :  { %v280_v40 = vpop.f32.mrb[3].mxu1  ;;  %459 = vmatprep.mubr.bf16.mxu1 %v3299_v5 }
 0x15b   :  { %v310_v41 = vpack.c.bf16 %v2616_v39, %v280_v40  ;;  %v2895_v39 = vld [vmem:[#allocation4 + $0x68] sm:$0xff]  }
 0x15c   :  { %v2896_v40 = vld [vmem:[#allocation4 + $0x28] sm:$0xff]  }
 0x15d   :  { %v2619_v42 = vpop.f32.mrb[4].mxu1 }
 0x15e   :  { %v290_v43 = vpop.f32.mrb[5].mxu1 }
 0x15f   :  { %v311_v44 = vpack.c.bf16 %v2619_v42, %v290_v43  ;;  %v2898_v42 = vld [vmem:[#allocation4 + $0x30] sm:$0xff]   ;;  %v2899_v43 = vld [vmem:[#allocation4 + $0x78] sm:$0xff]  }
 0x161   :  { %460 = vmatmul.mubr.bf16.gmra.mrb[12].mxu1 %v310_v41  ;;  %v2622_v45 = vpop.f32.mrb[6].mxu1  ;;  %v2897_v41 = vld [vmem:[#allocation4 + $0x70] sm:$0xff]  }
 0x162   :  { %467 = vmatprep.mubr.bf16.mxu1 %v3314_v9  ;;  %v300_v46 = vpop.f32.mrb[7].mxu1 }
 0x163   :  { %v312_v47 = vpack.c.bf16 %v2622_v45, %v300_v46 }
 0x169   :  { %468 = vmatmul.mubr.bf16.gmra.mrb[16].mxu1 %v311_v44  ;;  %v2900_v44 = vld [vmem:[#allocation4 + $0x38] sm:$0xff]  }
 0x16a   :  { %475 = vmatprep.mubr.bf16.mxu1 %v3324_v12 }
 0x171   :  { %476 = vmatmul.mubr.bf16.gmra.mrb[20].mxu1 %v312_v47 }
 0x172   :  { %2667 = vmatprep.mubr.msk.f32.mxu1 %vm179_vm0, %v3307_v8 }
 0x22c   :  { %v2291_v48 = vpop.f32.mrb[8].mxu1 }
 0x22d   :  { %v2292_v49 = vpop.f32.mrb[9].mxu1 }
 0x22e   :  { %v2293_v50 = vadd.f32 %v2292_v49, %v2291_v48  ;;  %v2294_v51 = vpop.f32.mrb[10].mxu1 }
 0x22f   :  { %v2295_v53 = vpop.f32.mrb[11].mxu1 }
 0x230   :  { %v2296_v54 = vadd.f32 %v2295_v53, %v2294_v51  ;;  %v3413_v55 = vadd.f32 %v2293_v50, %v2117_v52 }
 0x232   :  { %v3415_v56 = vadd.f32 %v2296_v54, %v2117_v52 }
 0x234   :  { %v2297_v57 = vpop.f32.mrb[12].mxu1  ;;  %v2779_v58 = vpack.c.bf16 %v3415_v56, %v3413_v55 }
 0x235   :  { %v2298_v59 = vpop.f32.mrb[13].mxu1 }
 0x236   :  { %v2299_v60 = vadd.f32 %v2298_v59, %v2297_v57  ;;  %v2300_v61 = vpop.f32.mrb[14].mxu1  ;;  %2780 = vmatprep.subr.bf16.mxu0 %v2779_v58  ;;  %v2901_v59 = vld [vmem:[#allocation6 + $0x40] sm:$0xff]  }
 0x237   :  { %v2301_v62 = vpop.f32.mrb[15].mxu1  ;;  %2782 = vmatpush3.bf16.msra.mxu0 %v2779_v58 }
 0x238   :  { %v2302_v63 = vadd.f32 %v2301_v62, %v2300_v61  ;;  %v3419_v0 = vadd.f32 %v2299_v60, %v2117_v52  ;;  %v2902_v60 = vld [vmem:[#allocation6] sm:$0xff]   ;;  %v2903_v61 = vld [vmem:[#allocation6 + $0x48] sm:$0xff]  }
 0x239   :  { %v2904_v62 = vld [vmem:[#allocation6 + $0x8] sm:$0xff]  }
 0x23a   :  { %v3421_v1 = vadd.f32 %v2302_v63, %v2117_v52  ;;  %v2905_v63 = vld [vmem:[#allocation6 + $0x50] sm:$0xff]  }
 0x23c   :  { %v2303_v2 = vpop.f32.mrb[16].mxu1  ;;  %v3425_v3 = vpack.c.bf16 %v3421_v1, %v3419_v0 }
 0x23d   :  { %v2304_v4 = vpop.f32.mrb[17].mxu1 }
 0x23e   :  { %v2305_v5 = vadd.f32 %v2304_v4, %v2303_v2  ;;  %v2306_v6 = vpop.f32.mrb[18].mxu1  ;;  %2784 = vmatprep.subr.bf16.mxu0 %v3425_v3  ;;  %v2906_v2 = vld [vmem:[#allocation6 + $0x10] sm:$0xff]   ;;  %v2908_v4 = vld [vmem:[#allocation6 + $0x18] sm:$0xff]  }
 0x23f   :  { %v2307_v7 = vpop.f32.mrb[19].mxu1  ;;  %2786 = vmatpush3.bf16.msra.mxu0 %v3425_v3 }
 0x240   :  { %v2308_v9 = vadd.f32 %v2307_v7, %v2306_v6  ;;  %v3429_v10 = vadd.f32 %v2305_v5, %v2117_v52  ;;  %v2909_v5 = vld [vmem:[#allocation6 + $0x60] sm:$0xff]   ;;  %v2911_v7 = vld [vmem:[#allocation6 + $0x68] sm:$0xff]  }
 0x241   :  { %v2910_v6 = vld [vmem:[#allocation6 + $0x20] sm:$0xff]  }
 0x242   :  { %v3431_v11 = vadd.f32 %v2308_v9, %v2117_v52  ;;  %v2912_v9 = vld [vmem:[#allocation6 + $0x28] sm:$0xff]  }
 0x244   :  { %v2309_v12 = vpop.f32.mrb[20].mxu1  ;;  %v3435_v13 = vpack.c.bf16 %v3431_v11, %v3429_v10 }
 0x245   :  { %v2310_v16 = vpop.f32.mrb[21].mxu1 }
 0x246   :  { %v2311_v17 = vadd.f32 %v2310_v16, %v2309_v12  ;;  %v2312_v19 = vpop.f32.mrb[22].mxu1  ;;  %2788 = vmatprep.subr.bf16.mxu0 %v3435_v13  ;;  %v2913_v12 = vld [vmem:[#allocation6 + $0x70] sm:$0xff]  }
 0x247   :  { %v2313_v21 = vpop.f32.mrb[23].mxu1  ;;  %2790 = vmatpush3.bf16.msra.mxu0 %v3435_v13 }
 0x248   :  { %v2314_v23 = vadd.f32 %v2313_v21, %v2312_v19  ;;  %v3439_v25 = vadd.f32 %v2311_v17, %v2117_v52 }
 0x24a   :  { %v3441_v27 = vadd.f32 %v2314_v23, %v2117_v52  ;;  %v2142_v23 = vld [vmem:[%s3719_s5] ss:$0 sm:$0xff] }
 0x24c   :  { %v2791_v28 = vpack.c.bf16 %v3441_v27, %v3439_v25 }
 0x24e   :  { %2792 = vmatprep.subr.bf16.mxu0 %v2791_v28 }
 0x24f   :  { %2794 = vmatpush3.bf16.msra.mxu0 %v2791_v28 }
 0x250   :  { %2331 = vmatprep.subr.bf16.mxu0 %v2885_v29 }
 0x252   :  { %2640 = vmatmul.mubr.msk.f32.vlgmr.msra.gmra.mrb[0].mxu0 %vm179_vm0, %v3331_v14 }
 0x253   :  { %2642 = vmatprep.mubr.msk.f32.mxu0 %vm179_vm0, %v3333_v15  ;;  %2332 = vmatpush3.bf16.msra.mxu0 %v2886_v30 }
 0x254   :  { %2333 = vmatprep.subr.bf16.mxu0 %v2887_v31 }
 0x256   :  { %2643 = vmatmul.mubr.msk.f32.gmra.mrb[2].mxu0 %vm179_vm0, %v3342_v18 }
 0x257   :  { %2645 = vmatprep.mubr.msk.f32.mxu0 %vm179_vm0, %v3349_v20  ;;  %2334 = vmatpush3.bf16.msra.mxu0 %v2888_v32 }
 0x258   :  { %2335 = vmatprep.subr.bf16.mxu0 %v2889_v33 }
 0x25a   :  { %2646 = vmatmul.mubr.msk.f32.gmra.mrb[4].mxu0 %vm179_vm0, %v3356_v22 }
 0x25b   :  { %2648 = vmatprep.mubr.msk.f32.mxu0 %vm179_vm0, %v3363_v24  ;;  %2336 = vmatpush3.bf16.msra.mxu0 %v2890_v34 }
 0x25c   :  { %2337 = vmatprep.subr.bf16.mxu0 %v2891_v35 }
 0x25e   :  { %2649 = vmatmul.mubr.msk.f32.gmra.mrb[6].mxu0 %vm179_vm0, %v3370_v26 }
 0x25f   :  { %764 = vmatprep.mubr.bf16.mxu0 %v2779_v58  ;;  %2338 = vmatpush3.bf16.msra.mxu0 %v2892_v36 }
 0x260   :  { %2339 = vmatprep.subr.bf16.mxu0 %v2893_v37 }
 0x263   :  { %2340 = vmatpush3.bf16.msra.mxu0 %v2894_v38 }
 0x264   :  { %2341 = vmatprep.subr.bf16.mxu0 %v2895_v39 }
 0x267   :  { %2342 = vmatpush3.bf16.msra.mxu0 %v2896_v40 }
 0x268   :  { %2343 = vmatprep.subr.bf16.mxu0 %v2897_v41 }
 0x26b   :  { %2344 = vmatpush3.bf16.msra.mxu0 %v2898_v42 }
 0x26c   :  { %2345 = vmatprep.subr.bf16.mxu0 %v2899_v43 }
 0x26f   :  { %2346 = vmatpush3.bf16.msra.mxu0 %v2900_v44 }
 0x270   :  { %2387 = vmatprep.subr.bf16.mxu0 %v2901_v59 }
 0x325   :  { %v2641_v45 = vpop.f32.mrb[0].mxu0 }
 0x326   :  { %v583_v46 = vpop.f32.mrb[1].mxu0 }
 0x327   :  { %v622_v47 = vpack.c.bf16 %v2641_v45, %v583_v46 }
 0x329   :  { %765 = vmatmul.mubr.bf16.vlgmr.msra.gmra.mrb[8].mxu0 %v622_v47  ;;  %v2644_v48 = vpop.f32.mrb[2].mxu0 }
 0x32a   :  { %772 = vmatprep.mubr.bf16.mxu0 %v3425_v3  ;;  %v593_v49 = vpop.f32.mrb[3].mxu0  ;;  %2388 = vmatpush3.bf16.msra.mxu0 %v2902_v60  ;;  %v2907_v3 = vld [vmem:[#allocation6 + $0x58] sm:$0xff]  }
 0x32b   :  { %v623_v50 = vpack.c.bf16 %v2644_v48, %v593_v49  ;;  %2389 = vmatprep.subr.bf16.mxu0 %v2903_v61 }
 0x32d   :  { %v2647_v51 = vpop.f32.mrb[4].mxu0 }
 0x32e   :  { %v603_v52 = vpop.f32.mrb[5].mxu0  ;;  %2390 = vmatpush3.bf16.msra.mxu0 %v2904_v62 }
 0x32f   :  { %v624_v53 = vpack.c.bf16 %v2647_v51, %v603_v52  ;;  %2391 = vmatprep.subr.bf16.mxu0 %v2905_v63 }
 0x331   :  { %773 = vmatmul.mubr.bf16.gmra.mrb[12].mxu0 %v623_v50  ;;  %v2650_v54 = vpop.f32.mrb[6].mxu0 }
 0x332   :  { %780 = vmatprep.mubr.bf16.mxu0 %v3435_v13  ;;  %v613_v57 = vpop.f32.mrb[7].mxu0  ;;  %2392 = vmatpush3.bf16.msra.mxu0 %v2906_v2  ;;  %v2914_v13 = vld [vmem:[#allocation6 + $0x30] sm:$0xff]  }
 0x333   :  { %v625_v58 = vpack.c.bf16 %v2650_v54, %v613_v57  ;;  %2393 = vmatprep.subr.bf16.mxu0 %v2907_v3 }
 0x336   :  { %2394 = vmatpush3.bf16.msra.mxu0 %v2908_v4 }
 0x337   :  { %2395 = vmatprep.subr.bf16.mxu0 %v2909_v5 }
 0x339   :  { %781 = vmatmul.mubr.bf16.gmra.mrb[16].mxu0 %v624_v53 }
 0x33a   :  { %788 = vmatprep.mubr.bf16.mxu0 %v2791_v28  ;;  %2396 = vmatpush3.bf16.msra.mxu0 %v2910_v6 }
 0x33b   :  { %2397 = vmatprep.subr.bf16.mxu0 %v2911_v7 }
 0x33e   :  { %2398 = vmatpush3.bf16.msra.mxu0 %v2912_v9 }
 0x33f   :  { %2399 = vmatprep.subr.bf16.mxu0 %v2913_v12 }
 0x341   :  { %789 = vmatmul.mubr.bf16.gmra.mrb[20].mxu0 %v625_v58 }
 0x342   :  { %2400 = vmatpush3.bf16.msra.mxu0 %v2914_v13 }
 0x3fc   :  { %v2347_v16 = vpop.f32.mrb[8].mxu0 }
 0x3fd   :  { %v2348_v17 = vpop.f32.mrb[9].mxu0 }
 0x3fe   :  { %v2349_v19 = vadd.f32 %v2348_v17, %v2347_v16  ;;  %v2350_v21 = vpop.f32.mrb[10].mxu0 }
 0x3ff   :  { %v2351_v28 = vpop.f32.mrb[11].mxu0 }
 0x400   :  { %v2352_v29 = vadd.f32 %v2351_v28, %v2350_v21  ;;  %v767_v30 = vadd.f32 %v2349_v19, %v2142_v23  ;;  %v2167_v19 = vld [vmem:[%s3721_s7] ss:$0 sm:$0xff] }
 0x402   :  { %v770_v31 = vadd.f32 %v2352_v29, %v2142_v23 }
 0x404   :  { %v2353_v32 = vpop.f32.mrb[12].mxu0  ;;  %v2795_v33 = vpack.c.bf16 %v770_v31, %v767_v30 }
 0x405   :  { %v2354_v34 = vpop.f32.mrb[13].mxu0 }
 0x406   :  { %v2355_v35 = vadd.f32 %v2354_v34, %v2353_v32  ;;  %v2356_v36 = vpop.f32.mrb[14].mxu0  ;;  %2796 = vmatprep.subr.bf16.mxu1 %v2795_v33  ;;  %1077 = vmatprep.mubr.bf16.mxu0 %v2795_v33 }
 0x407   :  { %v2357_v37 = vpop.f32.mrb[15].mxu0  ;;  %2798 = vmatpush3.bf16.msra.mxu1 %v2795_v33 }
 0x408   :  { %v2358_v38 = vadd.f32 %v2357_v37, %v2356_v36  ;;  %v775_v39 = vadd.f32 %v2355_v35, %v2142_v23 }
 0x40a   :  { %v778_v40 = vadd.f32 %v2358_v38, %v2142_v23 }
 0x40c   :  { %v2359_v41 = vpop.f32.mrb[16].mxu0  ;;  %v2799_v42 = vpack.c.bf16 %v778_v40, %v775_v39 }
 0x40d   :  { %v2360_v43 = vpop.f32.mrb[17].mxu0 }
 0x40e   :  { %v2361_v44 = vadd.f32 %v2360_v43, %v2359_v41  ;;  %v2362_v45 = vpop.f32.mrb[18].mxu0  ;;  %2800 = vmatprep.subr.bf16.mxu1 %v2799_v42 }
 0x40f   :  { %v2363_v46 = vpop.f32.mrb[19].mxu0  ;;  %2802 = vmatpush3.bf16.msra.mxu1 %v2799_v42 }
 0x410   :  { %v2364_v47 = vadd.f32 %v2363_v46, %v2362_v45  ;;  %v783_v48 = vadd.f32 %v2361_v44, %v2142_v23 }
 0x412   :  { %v786_v49 = vadd.f32 %v2364_v47, %v2142_v23 }
 0x414   :  { %v2365_v50 = vpop.f32.mrb[20].mxu0  ;;  %v2803_v51 = vpack.c.bf16 %v786_v49, %v783_v48 }
 0x415   :  { %v2366_v52 = vpop.f32.mrb[21].mxu0 }
 0x416   :  { %v2367_v53 = vadd.f32 %v2366_v52, %v2365_v50  ;;  %v2368_v54 = vpop.f32.mrb[22].mxu0  ;;  %2804 = vmatprep.subr.bf16.mxu1 %v2803_v51 }
 0x417   :  { %v2369_v57 = vpop.f32.mrb[23].mxu0  ;;  %2806 = vmatpush3.bf16.msra.mxu1 %v2803_v51 }
 0x418   :  { %v2370_v58 = vadd.f32 %v2369_v57, %v2368_v54  ;;  %v791_v59 = vadd.f32 %v2367_v53, %v2142_v23 }
 0x41a   :  { %v794_v60 = vadd.f32 %v2370_v58, %v2142_v23 }
 0x41c   :  { %v2807_v61 = vpack.c.bf16 %v794_v60, %v791_v59 }
 0x41e   :  { %2808 = vmatprep.subr.bf16.mxu1 %v2807_v61 }
 0x41f   :  { %2810 = vmatpush3.bf16.msra.mxu1 %v2807_v61 }
 0x422   :  { %2668 = vmatmul.mubr.msk.f32.vlgmr.msra.gmra.mrb[24].mxu1 %vm179_vm0, %v3331_v14  ;;  %v2915_v14 = vld [vmem:[#allocation6 + $0x78] sm:$0xff]  }
 0x423   :  { %2670 = vmatprep.mubr.msk.f32.mxu1 %vm179_vm0, %v3333_v15  ;;  %v2916_v15 = vld [vmem:[#allocation6 + $0x38] sm:$0xff]   ;;  %2401 = vmatprep.subr.bf16.mxu0 %v2915_v14 }
 0x424   :  { %2402 = vmatpush3.bf16.msra.mxu0 %v2916_v15 }
 0x426   :  { %2671 = vmatmul.mubr.msk.f32.gmra.mrb[26].mxu1 %vm179_vm0, %v3342_v18 }
 0x427   :  { %2673 = vmatprep.mubr.msk.f32.mxu1 %vm179_vm0, %v3349_v20 }
 0x42a   :  { %2674 = vmatmul.mubr.msk.f32.gmra.mrb[28].mxu1 %vm179_vm0, %v3356_v22 }
 0x42b   :  { %2676 = vmatprep.mubr.msk.f32.mxu1 %vm179_vm0, %v3363_v24 }
 0x42e   :  { %2677 = vmatmul.mubr.msk.f32.gmra.mrb[30].mxu1 %vm179_vm0, %v3370_v26 }
 0x42f   :  { %2695 = vmatprep.mubr.msk.f32.mxu1 %vm179_vm0, %v3307_v8 }
 0x4f5   :  { %v2669_v62 = vpop.f32.mrb[24].mxu1 }
 0x4f6   :  { %v896_v63 = vpop.f32.mrb[25].mxu1 }
 0x4f7   :  { %v935_v2 = vpack.c.bf16 %v2669_v62, %v896_v63 }
 0x4f9   :  { %1078 = vmatmul.mubr.bf16.vlgmr.msra.gmra.mrb[24].mxu0 %v935_v2  ;;  %v2672_v3 = vpop.f32.mrb[26].mxu1 }
 0x4fa   :  { %1085 = vmatprep.mubr.bf16.mxu0 %v2799_v42  ;;  %v906_v4 = vpop.f32.mrb[27].mxu1 }
 0x4fb   :  { %v936_v5 = vpack.c.bf16 %v2672_v3, %v906_v4 }
 0x4fd   :  { %v2675_v6 = vpop.f32.mrb[28].mxu1 }
 0x4fe   :  { %v916_v7 = vpop.f32.mrb[29].mxu1 }
 0x4ff   :  { %v937_v9 = vpack.c.bf16 %v2675_v6, %v916_v7 }
 0x501   :  { %1086 = vmatmul.mubr.bf16.gmra.mrb[28].mxu0 %v936_v5  ;;  %v2678_v12 = vpop.f32.mrb[30].mxu1 }
 0x502   :  { %1093 = vmatprep.mubr.bf16.mxu0 %v2803_v51  ;;  %v926_v13 = vpop.f32.mrb[31].mxu1 }
 0x503   :  { %v938_v16 = vpack.c.bf16 %v2678_v12, %v926_v13  ;;  %v2918_v12 = vld [vmem:[#allocation7] sm:$0xff]   ;;  %v3529_v13 = vld [vmem:[#allocation2 + $0x8] sm:$0xff] }
 0x509   :  { %1094 = vmatmul.mubr.bf16.gmra.mrb[32].mxu0 %v937_v9  ;;  %v2917_v9 = vld [vmem:[#allocation7 + $0x40] sm:$0xff]  }
 0x50a   :  { %1101 = vmatprep.mubr.bf16.mxu0 %v2807_v61 }
 0x511   :  { %1102 = vmatmul.mubr.bf16.gmra.mrb[36].mxu0 %v938_v16  ;;  %v3533_v16 = vld [vmem:[#allocation2 + $0x10] sm:$0xff] }
 0x512   :  { %2723 = vmatprep.mubr.msk.f32.mxu0 %vm179_vm0, %v3307_v8 }
 0x5cc   :  { %v2403_v17 = vpop.f32.mrb[24].mxu0 }
 0x5cd   :  { %v2404_v21 = vpop.f32.mrb[25].mxu0 }
 0x5ce   :  { %v2405_v23 = vadd.f32 %v2404_v21, %v2403_v17  ;;  %v2406_v28 = vpop.f32.mrb[26].mxu0  ;;  %v2921_v17 = vld [vmem:[#allocation7 + $0x50] sm:$0xff]   ;;  %v2923_v21 = vld [vmem:[#allocation7 + $0x58] sm:$0xff]  }
 0x5cf   :  { %v2407_v29 = vpop.f32.mrb[27].mxu0 }
 0x5d0   :  { %v1080_v30 = vadd.f32 %v2405_v23, %v2167_v19  ;;  %v2408_v31 = vadd.f32 %v2407_v29, %v2406_v28  ;;  %v2924_v23 = vld [vmem:[#allocation7 + $0x18] sm:$0xff]   ;;  %v2925_v28 = vld [vmem:[#allocation7 + $0x60] sm:$0xff]   ;;  %v2928_v29 = vld [vmem:[#allocation7 + $0x28] sm:$0xff]  }
 0x5d2   :  { %v1110_v32 = vadd.f32 %v1080_v30, %v3413_v55  ;;  %v1083_v33 = vadd.f32 %v2408_v31, %v2167_v19  ;;  %v2930_v30 = vld [vmem:[#allocation7 + $0x30] sm:$0xff]   ;;  %v2932_v31 = vld [vmem:[#allocation7 + $0x38] sm:$0xff]  }
 0x5d4   :  { %v1111_v34 = vadd.f32 %v1083_v33, %v3415_v56  ;;  %v2409_v35 = vpop.f32.mrb[28].mxu0  ;;  %v3487_v37 = vmul.f32 0.5, %v1110_v32 }
 0x5d5   :  { %v2410_v36 = vpop.f32.mrb[29].mxu0 }
 0x5d6   :  { %v3489_v8 = vmul.f32 0.5, %v1111_v34  ;;  %v2411_v38 = vadd.f32 %v2410_v36, %v2409_v35  ;;  %v2412_v39 = vpop.f32.mrb[30].mxu0 }
 0x5d7   :  { %v2413_v40 = vpop.f32.mrb[31].mxu0 }
 0x5d8   :  { %v1088_v41 = vadd.f32 %v2411_v38, %v2167_v19  ;;  %v2414_v42 = vadd.f32 %v2413_v40, %v2412_v39  ;;  %v3493_v43 = vpack.c.bf16 %v3489_v8, %v3487_v37 }
 0x5da   :  { %v1112_v55 = vadd.f32 %v1088_v41, %v3419_v0  ;;  %v1091_v44 = vadd.f32 %v2414_v42, %v2167_v19  ;;  %2812 = vmatprep.subr.bf16.mxu1 %v3493_v43 }
 0x5db   :  { %2814 = vmatpush3.bf16.msra.mxu1 %v3493_v43 }
 0x5dc   :  { %v1113_v56 = vadd.f32 %v1091_v44, %v3421_v1  ;;  %v2415_v45 = vpop.f32.mrb[32].mxu0  ;;  %v3499_v47 = vmul.f32 0.5, %v1112_v55  ;;  %v2933_v55 = vld [vmem:[%s3724_s10 + $0x40] sm:$0xff]  }
 0x5dd   :  { %v2416_v46 = vpop.f32.mrb[33].mxu0  ;;  %v2934_v44 = vld [vmem:[%s3724_s10] sm:$0xff]  }
 0x5de   :  { %v3501_v48 = vmul.f32 0.5, %v1113_v56  ;;  %v2417_v49 = vadd.f32 %v2416_v46, %v2415_v45  ;;  %v2418_v50 = vpop.f32.mrb[34].mxu0  ;;  %v2935_v56 = vld [vmem:[%s3724_s10 + $0x48] sm:$0xff]   ;;  %v2937_v46 = vld [vmem:[%s3724_s10 + $0x50] sm:$0xff]  }
 0x5df   :  { %v2419_v51 = vpop.f32.mrb[35].mxu0  ;;  %v2936_v45 = vld [vmem:[%s3724_s10 + $0x8] sm:$0xff]  }
 0x5e0   :  { %v1096_v52 = vadd.f32 %v2417_v49, %v2167_v19  ;;  %v2420_v53 = vadd.f32 %v2419_v51, %v2418_v50  ;;  %v3505_v0 = vpack.c.bf16 %v3501_v48, %v3499_v47  ;;  %v2938_v49 = vld [vmem:[%s3724_s10 + $0x10] sm:$0xff]   ;;  %v2939_v50 = vld [vmem:[%s3724_s10 + $0x58] sm:$0xff]  }
 0x5e1   :  { %v2940_v51 = vld [vmem:[%s3724_s10 + $0x18] sm:$0xff]  }
 0x5e2   :  { %v1114_v54 = vadd.f32 %v1096_v52, %v3429_v10  ;;  %v1099_v57 = vadd.f32 %v2420_v53, %v2167_v19  ;;  %2816 = vmatprep.subr.bf16.mxu1 %v3505_v0  ;;  %v2941_v52 = vld [vmem:[%s3724_s10 + $0x60] sm:$0xff]  }
 0x5e3   :  { %2818 = vmatpush3.bf16.msra.mxu1 %v3505_v0  ;;  %v2942_v53 = vld [vmem:[%s3724_s10 + $0x20] sm:$0xff]  }
 0x5e4   :  { %v1115_v1 = vadd.f32 %v1099_v57, %v3431_v11  ;;  %v2421_v58 = vpop.f32.mrb[36].mxu0  ;;  %v3511_v60 = vmul.f32 0.5, %v1114_v54  ;;  %v2944_v54 = vld [vmem:[%s3724_s10 + $0x28] sm:$0xff]   ;;  %v2945_v57 = vld [vmem:[%s3724_s10 + $0x70] sm:$0xff]  }
 0x5e5   :  { %v2422_v59 = vpop.f32.mrb[37].mxu0 }
 0x5e6   :  { %v3513_v61 = vmul.f32 0.5, %v1115_v1  ;;  %v2423_v14 = vadd.f32 %v2422_v59, %v2421_v58  ;;  %v2424_v15 = vpop.f32.mrb[38].mxu0  ;;  %v2946_v1 = vld [vmem:[%s3724_s10 + $0x30] sm:$0xff]  }
 0x5e7   :  { %v2425_v62 = vpop.f32.mrb[39].mxu0 }
 0x5e8   :  { %v1104_v63 = vadd.f32 %v2423_v14, %v2167_v19  ;;  %v2426_v2 = vadd.f32 %v2425_v62, %v2424_v15  ;;  %v3517_v10 = vpack.c.bf16 %v3513_v61, %v3511_v60  ;;  %v2192_v62 = vld [vmem:[#allocation9] ss:$0 sm:$0xff] }
 0x5ea   :  { %v1116_v3 = vadd.f32 %v1104_v63, %v3439_v25  ;;  %v1107_v4 = vadd.f32 %v2426_v2, %v2167_v19  ;;  %2820 = vmatprep.subr.bf16.mxu1 %v3517_v10  ;;  %v2919_v25 = vld [vmem:[#allocation7 + $0x48] sm:$0xff]   ;;  %v2922_v19 = vld [vmem:[#allocation7 + $0x10] sm:$0xff]  }
 0x5eb   :  { %2822 = vmatpush3.bf16.msra.mxu1 %v3517_v10 }
 0x5ec   :  { %v1117_v11 = vadd.f32 %v1107_v4, %v3441_v27  ;;  %v3523_v5 = vmul.f32 0.5, %v1116_v3  ;;  %v2920_v27 = vld [vmem:[#allocation7 + $0x8] sm:$0xff]  }
 0x5ee   :  { %v3525_v6 = vmul.f32 0.5, %v1117_v11 }
 0x5f0   :  { %v2823_v7 = vpack.c.bf16 %v3525_v6, %v3523_v5 }
 0x5f2   :  { %2824 = vmatprep.subr.bf16.mxu1 %v2823_v7 }
 0x5f3   :  { %2826 = vmatpush3.bf16.msra.mxu1 %v2823_v7 }
 0x5f4   :  { %2443 = vmatprep.subr.bf16.mxu1 %v2917_v9 }
 0x5f6   :  { %2696 = vmatmul.mubr.msk.f32.vlgmr.msra.gmra.mrb[32].mxu1 %vm179_vm0, %v3529_v13 }
 0x5f7   :  { %2698 = vmatprep.mubr.msk.f32.mxu1 %vm179_vm0, %v3533_v16  ;;  %2444 = vmatpush3.bf16.msra.mxu1 %v2918_v12 }
 0x5f8   :  { %2445 = vmatprep.subr.bf16.mxu1 %v2919_v25 }
 0x5fa   :  { %2699 = vmatmul.mubr.msk.f32.gmra.mrb[34].mxu1 %vm179_vm0, %v3342_v18  ;;  %v2926_v18 = vld [vmem:[#allocation7 + $0x20] sm:$0xff]  }
 0x5fb   :  { %2701 = vmatprep.mubr.msk.f32.mxu1 %vm179_vm0, %v3349_v20  ;;  %2446 = vmatpush3.bf16.msra.mxu1 %v2920_v27  ;;  %v2927_v20 = vld [vmem:[#allocation7 + $0x68] sm:$0xff]  }
 0x5fc   :  { %2447 = vmatprep.subr.bf16.mxu1 %v2921_v17 }
 0x5fe   :  { %2702 = vmatmul.mubr.msk.f32.gmra.mrb[36].mxu1 %vm179_vm0, %v3356_v22  ;;  %v2929_v22 = vld [vmem:[#allocation7 + $0x70] sm:$0xff]  }
 0x5ff   :  { %2704 = vmatprep.mubr.msk.f32.mxu1 %vm179_vm0, %v3363_v24  ;;  %2448 = vmatpush3.bf16.msra.mxu1 %v2922_v19  ;;  %v2931_v24 = vld [vmem:[#allocation7 + $0x78] sm:$0xff]  }
 0x600   :  { %2449 = vmatprep.subr.bf16.mxu1 %v2923_v21 }
 0x602   :  { %2705 = vmatmul.mubr.msk.f32.gmra.mrb[38].mxu1 %vm179_vm0, %v3370_v26 }
 0x603   :  { %1406 = vmatprep.mubr.bf16.mxu1 %v3493_v43  ;;  %2450 = vmatpush3.bf16.msra.mxu1 %v2924_v23 }
 0x604   :  { %2451 = vmatprep.subr.bf16.mxu1 %v2925_v28 }
 0x607   :  { %2452 = vmatpush3.bf16.msra.mxu1 %v2926_v18 }
 0x608   :  { %2453 = vmatprep.subr.bf16.mxu1 %v2927_v20 }
 0x60b   :  { %2454 = vmatpush3.bf16.msra.mxu1 %v2928_v29 }
 0x60c   :  { %2455 = vmatprep.subr.bf16.mxu1 %v2929_v22 }
 0x60f   :  { %2456 = vmatpush3.bf16.msra.mxu1 %v2930_v30 }
 0x610   :  { %2457 = vmatprep.subr.bf16.mxu1 %v2931_v24 }
 0x613   :  { %2458 = vmatpush3.bf16.msra.mxu1 %v2932_v31 }
 0x614   :  { %2499 = vmatprep.subr.bf16.mxu1 %v2933_v55  ;;  %v3608_v55 = vld [vmem:[#allocation2 + $0x30] sm:$0xff] }
 0x6c9   :  { %v2697_v32 = vpop.f32.mrb[32].mxu1 }
 0x6ca   :  { %v1225_v26 = vpop.f32.mrb[33].mxu1 }
 0x6cb   :  { %v1264_v33 = vpack.c.bf16 %v2697_v32, %v1225_v26 }
 0x6cd   :  { %1407 = vmatmul.mubr.bf16.vlgmr.msra.gmra.mrb[40].mxu1 %v1264_v33  ;;  %v2700_v34 = vpop.f32.mrb[34].mxu1 }
 0x6ce   :  { %1414 = vmatprep.mubr.bf16.mxu1 %v3505_v0  ;;  %v1235_v35 = vpop.f32.mrb[35].mxu1  ;;  %2500 = vmatpush3.bf16.msra.mxu1 %v2934_v44  ;;  %v2943_v0 = vld [vmem:[%s3724_s10 + $0x68] sm:$0xff]   ;;  %v3612_v44 = vld [vmem:[#allocation2 + $0x38] sm:$0xff] }
 0x6cf   :  { %v1265_v36 = vpack.c.bf16 %v2700_v34, %v1235_v35  ;;  %2501 = vmatprep.subr.bf16.mxu1 %v2935_v56  ;;  %v2972_v56 = vld [vmem:[#allocation2] sm:$0xff] }
 0x6d1   :  { %v2703_v38 = vpop.f32.mrb[36].mxu1 }
 0x6d2   :  { %v1245_v39 = vpop.f32.mrb[37].mxu1  ;;  %2502 = vmatpush3.bf16.msra.mxu1 %v2936_v45  ;;  %v2947_v45 = vld [vmem:[%s3724_s10 + $0x78] sm:$0xff]  }
 0x6d3   :  { %v1266_v40 = vpack.c.bf16 %v2703_v38, %v1245_v39  ;;  %2503 = vmatprep.subr.bf16.mxu1 %v2937_v46  ;;  %v2948_v46 = vld [vmem:[%s3724_s10 + $0x38] sm:$0xff]  }
 0x6d5   :  { %1415 = vmatmul.mubr.bf16.gmra.mrb[44].mxu1 %v1265_v36  ;;  %v2706_v41 = vpop.f32.mrb[38].mxu1 }
 0x6d6   :  { %1422 = vmatprep.mubr.bf16.mxu1 %v3517_v10  ;;  %v1255_v42 = vpop.f32.mrb[39].mxu1  ;;  %2504 = vmatpush3.bf16.msra.mxu1 %v2938_v49 }
 0x6d7   :  { %v1267_v43 = vpack.c.bf16 %v2706_v41, %v1255_v42  ;;  %2505 = vmatprep.subr.bf16.mxu1 %v2939_v50  ;;  %v3596_v41 = vld [vmem:[#allocation2 + $0x18] sm:$0xff]  ;;  %v3600_v42 = vld [vmem:[#allocation2 + $0x20] sm:$0xff] }
 0x6da   :  { %2506 = vmatpush3.bf16.msra.mxu1 %v2940_v51 }
 0x6db   :  { %2507 = vmatprep.subr.bf16.mxu1 %v2941_v52 }
 0x6dd   :  { %1423 = vmatmul.mubr.bf16.gmra.mrb[48].mxu1 %v1266_v40 }
 0x6de   :  { %1430 = vmatprep.mubr.bf16.mxu1 %v2823_v7  ;;  %2508 = vmatpush3.bf16.msra.mxu1 %v2942_v53 }
 0x6df   :  { %2509 = vmatprep.subr.bf16.mxu1 %v2943_v0 }
 0x6e2   :  { %2510 = vmatpush3.bf16.msra.mxu1 %v2944_v54 }
 0x6e3   :  { %2511 = vmatprep.subr.bf16.mxu1 %v2945_v57 }
 0x6e5   :  { %1431 = vmatmul.mubr.bf16.gmra.mrb[52].mxu1 %v1267_v43  ;;  %v3604_v43 = vld [vmem:[#allocation2 + $0x28] sm:$0xff] }
 0x6e6   :  { %2512 = vmatpush3.bf16.msra.mxu1 %v2946_v1 }
 0x6e7   :  { %2513 = vmatprep.subr.bf16.mxu1 %v2947_v45 }
 0x6ea   :  { %2514 = vmatpush3.bf16.msra.mxu1 %v2948_v46 }
 0x7a0   :  { %v2459_v58 = vpop.f32.mrb[40].mxu1 }
 0x7a1   :  { %v2460_v59 = vpop.f32.mrb[41].mxu1 }
 0x7a2   :  { %v2461_v14 = vadd.f32 %v2460_v59, %v2459_v58  ;;  %v2462_v15 = vpop.f32.mrb[42].mxu1 }
 0x7a3   :  { %v2463_v63 = vpop.f32.mrb[43].mxu1 }
 0x7a4   :  { %v2464_v2 = vadd.f32 %v2463_v63, %v2462_v15  ;;  %v1409_v10 = vadd.f32 %v2461_v14, %v2192_v62 }
 0x7a6   :  { %v1412_v3 = vadd.f32 %v2464_v2, %v2192_v62 }
 0x7a8   :  { %v2465_v4 = vpop.f32.mrb[44].mxu1  ;;  %v2827_v11 = vpack.c.bf16 %v1412_v3, %v1409_v10 }
 0x7a9   :  { %v2466_v7 = vpop.f32.mrb[45].mxu1 }
 0x7aa   :  { %v2467_v9 = vadd.f32 %v2466_v7, %v2465_v4  ;;  %v2468_v12 = vpop.f32.mrb[46].mxu1  ;;  %2828 = vmatprep.subr.bf16.mxu0 %v2827_v11  ;;  %1719 = vmatprep.mubr.bf16.mxu1 %v2827_v11 }
 0x7ab   :  { %v2469_v25 = vpop.f32.mrb[47].mxu1  ;;  %2830 = vmatpush3.bf16.msra.mxu0 %v2827_v11 }
 0x7ac   :  { %v2470_v27 = vadd.f32 %v2469_v25, %v2468_v12  ;;  %v1417_v17 = vadd.f32 %v2467_v9, %v2192_v62 }
 0x7ae   :  { %v1420_v19 = vadd.f32 %v2470_v27, %v2192_v62 }
 0x7b0   :  { %v2471_v21 = vpop.f32.mrb[48].mxu1  ;;  %v2831_v23 = vpack.c.bf16 %v1420_v19, %v1417_v17 }
 0x7b1   :  { %v2472_v28 = vpop.f32.mrb[49].mxu1 }
 0x7b2   :  { %v2473_v18 = vadd.f32 %v2472_v28, %v2471_v21  ;;  %v2474_v20 = vpop.f32.mrb[50].mxu1  ;;  %2832 = vmatprep.subr.bf16.mxu0 %v2831_v23 }
 0x7b3   :  { %v2475_v29 = vpop.f32.mrb[51].mxu1  ;;  %2834 = vmatpush3.bf16.msra.mxu0 %v2831_v23 }
 0x7b4   :  { %v2476_v22 = vadd.f32 %v2475_v29, %v2474_v20  ;;  %v1425_v30 = vadd.f32 %v2473_v18, %v2192_v62 }
 0x7b6   :  { %v1428_v24 = vadd.f32 %v2476_v22, %v2192_v62 }
 0x7b8   :  { %v2477_v31 = vpop.f32.mrb[52].mxu1  ;;  %v2835_v32 = vpack.c.bf16 %v1428_v24, %v1425_v30 }
 0x7b9   :  { %v2478_v26 = vpop.f32.mrb[53].mxu1 }
 0x7ba   :  { %v2479_v33 = vadd.f32 %v2478_v26, %v2477_v31  ;;  %v2480_v34 = vpop.f32.mrb[54].mxu1  ;;  %2836 = vmatprep.subr.bf16.mxu0 %v2835_v32 }
 0x7bb   :  { %v2481_v35 = vpop.f32.mrb[55].mxu1  ;;  %2838 = vmatpush3.bf16.msra.mxu0 %v2835_v32 }
 0x7bc   :  { %v2482_v36 = vadd.f32 %v2481_v35, %v2480_v34  ;;  %v1433_v38 = vadd.f32 %v2479_v33, %v2192_v62 }
 0x7be   :  { %v1436_v39 = vadd.f32 %v2482_v36, %v2192_v62  ;;  %v2217_v62 = vld [vmem:[%s3725_s11] ss:$0 sm:$0xff] }
 0x7c0   :  { %v2839_v40 = vpack.c.bf16 %v1436_v39, %v1433_v38 }
 0x7c2   :  { %2840 = vmatprep.subr.bf16.mxu0 %v2839_v40 }
 0x7c3   :  { %2842 = vmatpush3.bf16.msra.mxu0 %v2839_v40 }
 0x7c6   :  { %2724 = vmatmul.mubr.msk.f32.vlgmr.msra.gmra.mrb[40].mxu0 %vm179_vm0, %v3529_v13 }
 0x7c7   :  { %2726 = vmatprep.mubr.msk.f32.mxu0 %vm179_vm0, %v3533_v16 }
 0x7ca   :  { %2727 = vmatmul.mubr.msk.f32.gmra.mrb[42].mxu0 %vm179_vm0, %v3596_v41 }
 0x7cb   :  { %2729 = vmatprep.mubr.msk.f32.mxu0 %vm179_vm0, %v3600_v42 }
 0x7ce   :  { %2730 = vmatmul.mubr.msk.f32.gmra.mrb[44].mxu0 %vm179_vm0, %v3604_v43 }
 0x7cf   :  { %2732 = vmatprep.mubr.msk.f32.mxu0 %vm179_vm0, %v3608_v55 }
 0x7d2   :  { %2733 = vmatmul.mubr.msk.f32.gmra.mrb[46].mxu0 %vm179_vm0, %v3612_v44 }
 0x7d3   :  { %2751 = vmatprep.mubr.msk.f32.mxu0 %vm179_vm0, %v2972_v56 }
 0x899   :  { %v2725_v49 = vpop.f32.mrb[40].mxu0 }
 0x89a   :  { %v1538_v50 = vpop.f32.mrb[41].mxu0 }
 0x89b   :  { %v1577_v51 = vpack.c.bf16 %v2725_v49, %v1538_v50 }
 0x89d   :  { %1720 = vmatmul.mubr.bf16.vlgmr.msra.gmra.mrb[56].mxu1 %v1577_v51  ;;  %v2728_v52 = vpop.f32.mrb[42].mxu0 }
 0x89e   :  { %1727 = vmatprep.mubr.bf16.mxu1 %v2831_v23  ;;  %v1548_v53 = vpop.f32.mrb[43].mxu0 }
 0x89f   :  { %v1578_v0 = vpack.c.bf16 %v2728_v52, %v1548_v53 }
 0x8a1   :  { %v2731_v54 = vpop.f32.mrb[44].mxu0 }
 0x8a2   :  { %v1558_v57 = vpop.f32.mrb[45].mxu0 }
 0x8a3   :  { %v1579_v1 = vpack.c.bf16 %v2731_v54, %v1558_v57 }
 0x8a5   :  { %1728 = vmatmul.mubr.bf16.gmra.mrb[60].mxu1 %v1578_v0  ;;  %v2734_v58 = vpop.f32.mrb[46].mxu0 }
 0x8a6   :  { %1735 = vmatprep.mubr.bf16.mxu1 %v2835_v32  ;;  %v1568_v59 = vpop.f32.mrb[47].mxu0 }
 0x8a7   :  { %v1580_v14 = vpack.c.bf16 %v2734_v58, %v1568_v59  ;;  %v2949_v59 = vld [vmem:[#allocation10 + $0x40] sm:$0xff]  }
 0x8ad   :  { %1736 = vmatmul.mubr.bf16.gmra.mrb[64].mxu1 %v1579_v1 }
 0x8ae   :  { %1743 = vmatprep.mubr.bf16.mxu1 %v2839_v40 }
 0x8b5   :  { %1744 = vmatmul.mubr.bf16.gmra.mrb[68].mxu1 %v1580_v14  ;;  %v2951_v14 = vld [vmem:[#allocation10 + $0x48] sm:$0xff]  }
 0x970   :  { %v2515_v15 = vpop.f32.mrb[56].mxu1 }
 0x971   :  { %v2516_v63 = vpop.f32.mrb[57].mxu1 }
 0x972   :  { %v2517_v2 = vadd.f32 %v2516_v63, %v2515_v15  ;;  %v2518_v10 = vpop.f32.mrb[58].mxu1  ;;  %v2953_v15 = vld [vmem:[#allocation10 + $0x50] sm:$0xff]   ;;  %v2955_v63 = vld [vmem:[#allocation10 + $0x58] sm:$0xff]  }
 0x973   :  { %v2519_v3 = vpop.f32.mrb[59].mxu1 }
 0x974   :  { %v1722_v4 = vadd.f32 %v2517_v2, %v2217_v62  ;;  %v2520_v11 = vadd.f32 %v2519_v3, %v2518_v10  ;;  %v2960_v2 = vld [vmem:[#allocation10 + $0x28] sm:$0xff]   ;;  %v2962_v10 = vld [vmem:[#allocation10 + $0x30] sm:$0xff]   ;;  %v2964_v3 = vld [vmem:[#allocation10 + $0x38] sm:$0xff]  }
 0x976   :  { %v1752_v7 = vadd.f32 %v1722_v4, %v3487_v37  ;;  %v1725_v9 = vadd.f32 %v2520_v11, %v2217_v62 }
 0x978   :  { %v1760_v12 = vmul.f32 0.5, %v1752_v7  ;;  %v1753_v25 = vadd.f32 %v1725_v9, %v3489_v8  ;;  %v2521_v27 = vpop.f32.mrb[60].mxu1 }
 0x979   :  { %v2522_v17 = vpop.f32.mrb[61].mxu1 }
 0x97a   :  { %1768 = vst [vmem:[%s3729_s15] sm:$0xff] %v1760_v12  ;;  %v1761_v19 = vmul.f32 0.5, %v1753_v25  ;;  %v2523_v21 = vadd.f32 %v2522_v17, %v2521_v27  ;;  %v2524_v23 = vpop.f32.mrb[62].mxu1 }
 0x97b   :  { %v2525_v28 = vpop.f32.mrb[63].mxu1 }
 0x97c   :  { %1769 = vst [vmem:[%s3729_s15 + $0x8] sm:$0xff] %v1761_v19  ;;  %v1730_v18 = vadd.f32 %v2523_v21, %v2217_v62  ;;  %v2526_v37 = vadd.f32 %v2525_v28, %v2524_v23  ;;  %v3634_v20 = vpack.c.bf16 %v1761_v19, %v1760_v12 }
 0x97e   :  { %v1754_v8 = vadd.f32 %v1730_v18, %v3499_v47  ;;  %v1733_v29 = vadd.f32 %v2526_v37, %v2217_v62  ;;  %2844 = vmatprep.subr.bf16.mxu0 %v3634_v20  ;;  %v2242_v18 = vld [vmem:[%s3727_s13] ss:$0 sm:$0xff] }
 0x97f   :  { %2846 = vmatpush3.bf16.msra.mxu0 %v3634_v20 }
 0x980   :  { %v1762_v22 = vmul.f32 0.5, %v1754_v8  ;;  %v1755_v30 = vadd.f32 %v1733_v29, %v3501_v48  ;;  %v2527_v24 = vpop.f32.mrb[64].mxu1 }
 0x981   :  { %v2528_v31 = vpop.f32.mrb[65].mxu1 }
 0x982   :  { %1770 = vst [vmem:[%s3729_s15 + $0x10] sm:$0xff] %v1762_v22  ;;  %v1763_v32 = vmul.f32 0.5, %v1755_v30  ;;  %v2529_v26 = vadd.f32 %v2528_v31, %v2527_v24  ;;  %v2530_v33 = vpop.f32.mrb[66].mxu1 }
 0x983   :  { %v2531_v34 = vpop.f32.mrb[67].mxu1 }
 0x984   :  { %1771 = vst [vmem:[%s3729_s15 + $0x18] sm:$0xff] %v1763_v32  ;;  %v1738_v47 = vadd.f32 %v2529_v26, %v2217_v62  ;;  %v2532_v35 = vadd.f32 %v2531_v34, %v2530_v33  ;;  %v3646_v36 = vpack.c.bf16 %v1763_v32, %v1762_v22 }
 0x986   :  { %v1756_v48 = vadd.f32 %v1738_v47, %v3511_v60  ;;  %v1741_v38 = vadd.f32 %v2532_v35, %v2217_v62  ;;  %2848 = vmatprep.subr.bf16.mxu0 %v3646_v36 }
 0x987   :  { %2850 = vmatpush3.bf16.msra.mxu0 %v3646_v36 }
 0x988   :  { %v1764_v39 = vmul.f32 0.5, %v1756_v48  ;;  %v1757_v40 = vadd.f32 %v1741_v38, %v3513_v61  ;;  %v2533_v56 = vpop.f32.mrb[68].mxu1 }
 0x989   :  { %v2534_v45 = vpop.f32.mrb[69].mxu1 }
 0x98a   :  { %1772 = vst [vmem:[%s3729_s15 + $0x20] sm:$0xff] %v1764_v39  ;;  %v1765_v46 = vmul.f32 0.5, %v1757_v40  ;;  %v2535_v49 = vadd.f32 %v2534_v45, %v2533_v56  ;;  %v2536_v50 = vpop.f32.mrb[70].mxu1 }
 0x98b   :  { %v2537_v51 = vpop.f32.mrb[71].mxu1 }
 0x98c   :  { %1773 = vst [vmem:[%s3729_s15 + $0x28] sm:$0xff] %v1765_v46  ;;  %v1746_v60 = vadd.f32 %v2535_v49, %v2217_v62  ;;  %v2538_v52 = vadd.f32 %v2537_v51, %v2536_v50  ;;  %v3658_v53 = vpack.c.bf16 %v1765_v46, %v1764_v39 }
 0x98e   :  { %v1758_v61 = vadd.f32 %v1746_v60, %v3523_v5  ;;  %v1749_v0 = vadd.f32 %v2538_v52, %v2217_v62  ;;  %2852 = vmatprep.subr.bf16.mxu0 %v3658_v53  ;;  %v2950_v5 = vld [vmem:[#allocation10] sm:$0xff]   ;;  %v2954_v62 = vld [vmem:[#allocation10 + $0x10] sm:$0xff]  }
 0x98f   :  { %2854 = vmatpush3.bf16.msra.mxu0 %v3658_v53 }
 0x990   :  { %v1766_v54 = vmul.f32 0.5, %v1758_v61  ;;  %v1759_v57 = vadd.f32 %v1749_v0, %v3525_v6  ;;  %v2952_v6 = vld [vmem:[#allocation10 + $0x8] sm:$0xff]  }
 0x992   :  { %1774 = vst [vmem:[%s3729_s15 + $0x30] sm:$0xff] %v1766_v54  ;;  %v1767_v1 = vmul.f32 0.5, %v1759_v57 }
 0x994   :  { %1775 = vst [vmem:[%s3729_s15 + $0x38] sm:$0xff] %v1767_v1  ;;  %v2855_v58 = vpack.c.bf16 %v1767_v1, %v1766_v54 }
 0x996   :  { %2856 = vmatprep.subr.bf16.mxu0 %v2855_v58 }
 0x997   :  { %2858 = vmatpush3.bf16.msra.mxu0 %v2855_v58 }
 0x998   :  { %2555 = vmatprep.subr.bf16.mxu0 %v2949_v59 }
 0x99a   :  { %2752 = vmatmul.mubr.msk.f32.vlgmr.msra.gmra.mrb[48].mxu0 %vm179_vm0, %v3529_v13  ;;  %v2956_v13 = vld [vmem:[#allocation10 + $0x18] sm:$0xff]  }
 0x99b   :  { %2754 = vmatprep.mubr.msk.f32.mxu0 %vm179_vm0, %v3533_v16  ;;  %2556 = vmatpush3.bf16.msra.mxu0 %v2950_v5  ;;  %v2957_v16 = vld [vmem:[#allocation10 + $0x60] sm:$0xff]  }
 0x99c   :  { %2557 = vmatprep.subr.bf16.mxu0 %v2951_v14 }
 0x99e   :  { %2755 = vmatmul.mubr.msk.f32.gmra.mrb[50].mxu0 %vm179_vm0, %v3596_v41  ;;  %v2958_v41 = vld [vmem:[#allocation10 + $0x20] sm:$0xff]  }
 0x99f   :  { %2757 = vmatprep.mubr.msk.f32.mxu0 %vm179_vm0, %v3600_v42  ;;  %2558 = vmatpush3.bf16.msra.mxu0 %v2952_v6  ;;  %v2959_v42 = vld [vmem:[#allocation10 + $0x68] sm:$0xff]  }
 0x9a0   :  { %2559 = vmatprep.subr.bf16.mxu0 %v2953_v15 }
 0x9a2   :  { %2758 = vmatmul.mubr.msk.f32.gmra.mrb[52].mxu0 %vm179_vm0, %v3604_v43  ;;  %v2961_v43 = vld [vmem:[#allocation10 + $0x70] sm:$0xff]  }
 0x9a3   :  { %2760 = vmatprep.mubr.msk.f32.mxu0 %vm179_vm0, %v3608_v55  ;;  %2560 = vmatpush3.bf16.msra.mxu0 %v2954_v62  ;;  %v2963_v55 = vld [vmem:[#allocation10 + $0x78] sm:$0xff]  }
 0x9a4   :  { %2561 = vmatprep.subr.bf16.mxu0 %v2955_v63 }
 0x9a6   :  { %2761 = vmatmul.mubr.msk.f32.gmra.mrb[54].mxu0 %vm179_vm0, %v3612_v44 }
 0x9a7   :  { %2056 = vmatprep.mubr.bf16.mxu0 %v3634_v20  ;;  %2562 = vmatpush3.bf16.msra.mxu0 %v2956_v13 }
 0x9a8   :  { %2563 = vmatprep.subr.bf16.mxu0 %v2957_v16 }
 0x9ab   :  { %2564 = vmatpush3.bf16.msra.mxu0 %v2958_v41 }
 0x9ac   :  { %2565 = vmatprep.subr.bf16.mxu0 %v2959_v42 }
 0x9af   :  { %2566 = vmatpush3.bf16.msra.mxu0 %v2960_v2 }
 0x9b0   :  { %2567 = vmatprep.subr.bf16.mxu0 %v2961_v43 }
 0x9b3   :  { %2568 = vmatpush3.bf16.msra.mxu0 %v2962_v10 }
 0x9b4   :  { %2569 = vmatprep.subr.bf16.mxu0 %v2963_v55 }
 0x9b7   :  { %2570 = vmatpush3.bf16.msra.mxu0 %v2964_v3 }
 0xa6d   :  { %v2753_v4 = vpop.f32.mrb[48].mxu0 }
 0xa6e   :  { %v1875_v44 = vpop.f32.mrb[49].mxu0 }
 0xa6f   :  { %v1914_v11 = vpack.c.bf16 %v2753_v4, %v1875_v44 }
 0xa71   :  { %2057 = vmatmul.mubr.bf16.vlgmr.msra.gmra.mrb[56].mxu0 %v1914_v11  ;;  %v2756_v7 = vpop.f32.mrb[50].mxu0 }
 0xa72   :  { %2064 = vmatprep.mubr.bf16.mxu0 %v3646_v36  ;;  %v1885_v9 = vpop.f32.mrb[51].mxu0 }
 0xa73   :  { %v1915_v12 = vpack.c.bf16 %v2756_v7, %v1885_v9 }
 0xa75   :  { %v2759_v25 = vpop.f32.mrb[52].mxu0 }
 0xa76   :  { %v1895_v27 = vpop.f32.mrb[53].mxu0 }
 0xa77   :  { %v1916_v17 = vpack.c.bf16 %v2759_v25, %v1895_v27 }
 0xa79   :  { %2065 = vmatmul.mubr.bf16.gmra.mrb[60].mxu0 %v1915_v12  ;;  %v2762_v19 = vpop.f32.mrb[54].mxu0 }
 0xa7a   :  { %2072 = vmatprep.mubr.bf16.mxu0 %v3658_v53  ;;  %v1905_v21 = vpop.f32.mrb[55].mxu0 }
 0xa7b   :  { %v1917_v23 = vpack.c.bf16 %v2762_v19, %v1905_v21 }
 0xa81   :  { %2073 = vmatmul.mubr.bf16.gmra.mrb[64].mxu0 %v1916_v17 }
 0xa82   :  { %2080 = vmatprep.mubr.bf16.mxu0 %v2855_v58 }
 0xa89   :  { %2081 = vmatmul.mubr.bf16.gmra.mrb[68].mxu0 %v1917_v23 }
 0xb44   :  { %v2571_v28 = vpop.f32.mrb[56].mxu0 }
 0xb45   :  { %v2572_v37 = vpop.f32.mrb[57].mxu0 }
 0xb46   :  { %v2573_v20 = vadd.f32 %v2572_v37, %v2571_v28  ;;  %v2574_v8 = vpop.f32.mrb[58].mxu0 }
 0xb47   :  { %v2575_v29 = vpop.f32.mrb[59].mxu0 }
 0xb48   :  { %v2059_v22 = vadd.f32 %v2573_v20, %v2242_v18  ;;  %v2576_v30 = vadd.f32 %v2575_v29, %v2574_v8 }
 0xb4a   :  { %2089 = vst [vmem:[%s3732_s20] sm:$0xff] %v2059_v22  ;;  %v2062_v24 = vadd.f32 %v2576_v30, %v2242_v18 }
 0xb4c   :  { %2090 = vst [vmem:[%s3732_s20 + $0x8] sm:$0xff] %v2062_v24  ;;  %v2577_v31 = vpop.f32.mrb[60].mxu0 }
 0xb4d   :  { %v2578_v32 = vpop.f32.mrb[61].mxu0 }
 0xb4e   :  { %v2579_v26 = vadd.f32 %v2578_v32, %v2577_v31  ;;  %v2580_v33 = vpop.f32.mrb[62].mxu0 }
 0xb4f   :  { %v2581_v34 = vpop.f32.mrb[63].mxu0 }
 0xb50   :  { %v2067_v47 = vadd.f32 %v2579_v26, %v2242_v18  ;;  %v2582_v35 = vadd.f32 %v2581_v34, %v2580_v33 }
 0xb52   :  { %2091 = vst [vmem:[%s3732_s20 + $0x10] sm:$0xff] %v2067_v47  ;;  %v2070_v36 = vadd.f32 %v2582_v35, %v2242_v18 }
 0xb54   :  { %2092 = vst [vmem:[%s3732_s20 + $0x18] sm:$0xff] %v2070_v36  ;;  %v2583_v48 = vpop.f32.mrb[64].mxu0 }
 0xb55   :  { %v2584_v38 = vpop.f32.mrb[65].mxu0 }
 0xb56   :  { %v2585_v39 = vadd.f32 %v2584_v38, %v2583_v48  ;;  %v2586_v40 = vpop.f32.mrb[66].mxu0 }
 0xb57   :  { %v2587_v56 = vpop.f32.mrb[67].mxu0 }
 0xb58   :  { %v2075_v45 = vadd.f32 %v2585_v39, %v2242_v18  ;;  %v2588_v46 = vadd.f32 %v2587_v56, %v2586_v40 }
 0xb5a   :  { %2093 = vst [vmem:[%s3732_s20 + $0x20] sm:$0xff] %v2075_v45  ;;  %v2078_v49 = vadd.f32 %v2588_v46, %v2242_v18 }
 0xb5c   :  { %2094 = vst [vmem:[%s3732_s20 + $0x28] sm:$0xff] %v2078_v49  ;;  %v2589_v50 = vpop.f32.mrb[68].mxu0 }
 0xb5d   :  { %v2590_v51 = vpop.f32.mrb[69].mxu0 }
 0xb5e   :  { %v2591_v60 = vadd.f32 %v2590_v51, %v2589_v50  ;;  %v2592_v52 = vpop.f32.mrb[70].mxu0 }
 0xb5f   :  { %v2593_v53 = vpop.f32.mrb[71].mxu0 }
 0xb60   :  { %v2083_v61 = vadd.f32 %v2591_v60, %v2242_v18  ;;  %v2594_v0 = vadd.f32 %v2593_v53, %v2592_v52 }
 0xb62   :  { %2095 = vst [vmem:[%s3732_s20 + $0x30] sm:$0xff] %v2083_v61  ;;  %v2086_v54 = vadd.f32 %v2594_v0, %v2242_v18 }
 0xb64   :  { %2096 = vst [vmem:[%s3732_s20 + $0x38] sm:$0xff] %v2086_v54 }
 0xb65   :  { %2105 = vsyncpa [#allocation3], 1 }
 0xb66   :  { %2106 = vsyncpa [#allocation5], 1 }
 0xb67   :  { %2107 = vsyncpa [#allocation8], 1 }
 0xb68   :  { %2108 = vsyncpa [#allocation11], 1 }

</bundles_post_ra>
